<compile_context>
chip_gen: v6e
topology: v6e:2x2x1
jax: 0.10.0
libtpu: 0.0.40
codegen_flags: <defaults>
</compile_context>

<pallas_src>
import jax
import jax.numpy as jnp
from jax.experimental import pallas as pl
from jax.experimental.pallas import tpu as pltpu


def _linear_kernel(x_ref, w_ref, b_ref, o_ref):
    # x_ref: (S, 128, D) VMEM   -- S*128 samples, D features each
    # w_ref: (1, D)      VMEM   -- weight row (PyTorch layout, resident)
    # b_ref: (1, 1)      SMEM   -- bias scalar
    # o_ref: (S, 128)    VMEM   -- lane-dense predictions
    x = x_ref[...]
    w = w_ref[...]                      # (1, D) broadcasts against (S, 128, D)
    acc = jnp.sum(x * w, axis=-1)       # VPU multiply + XLU lane reduce (f32)
    o_ref[...] = (acc + b_ref[0, 0]).astype(o_ref.dtype)


def linear_forward(data, weight, bias, *, tile_n=8192):
    """Equivalent of torch.nn.Linear(input_dim, 1).forward.

    data:   (N, D) float32
    weight: (1, D) float32   (PyTorch convention [out_features, in_features])
    bias:   (1,)   float32
    returns (N, 1) float32
    """
    n, d = data.shape

    # Tile granule: 8 sublanes x 128 lanes of outputs per step => TILE_N must
    # be a multiple of 1024. Clamp so tiny inputs are not grossly over-padded.
    tile_n = max(1024, (tile_n // 1024) * 1024)
    tile_n = min(tile_n, pl.cdiv(n, 1024) * 1024)
    n_pad = pl.cdiv(n, tile_n) * tile_n

    if n_pad != n:
        data = jnp.pad(data, ((0, n_pad - n), (0, 0)))

    # Contiguous (free) reshape: group samples into rows of 128 lanes.
    x_r = data.reshape(n_pad // 128, 128, d)
    b = bias.reshape(1, 1).astype(jnp.float32)

    s = tile_n // 128                      # output sublane rows per grid step
    grid = (n_pad // tile_n,)

    out2d = pl.pallas_call(
        _linear_kernel,
        grid=grid,
        out_shape=jax.ShapeDtypeStruct((n_pad // 128, 128), data.dtype),
        in_specs=[
            pl.BlockSpec((s, 128, d), lambda i: (i, 0, 0)),    # x tile
            pl.BlockSpec((1, d), lambda i: (0, 0)),            # weight row
            pl.BlockSpec(memory_space=pltpu.SMEM),             # bias scalar
        ],
        out_specs=pl.BlockSpec((s, 128), lambda i: (i, 0)),    # lane-dense out
        compiler_params=pltpu.CompilerParams(
            dimension_semantics=("parallel",),
        ),
    )(x_r, weight, b)

    # Back to the PyTorch output shape (N, 1); drop padded rows.
    return out2d.reshape(-1)[:n].reshape(n, 1)


if __name__ == "__main__":
    key = jax.random.PRNGKey(0)
    k_x, k_w, k_b = jax.random.split(key, 3)

    # Small shapes consistent with the module: batch=8 samples, input_dim=32.
    N, D = 8, 32
    data = jax.random.normal(k_x, (N, D), dtype=jnp.float32)

    # Deterministic parameter init (mimics torch.nn.Linear uniform(-1/sqrt(D), 1/sqrt(D))).
    bound = 1.0 / jnp.sqrt(jnp.float32(D))
    weight = jax.random.uniform(k_w, (1, D), minval=-bound, maxval=bound, dtype=jnp.float32)
    bias = jax.random.uniform(k_b, (1,), minval=-bound, maxval=bound, dtype=jnp.float32)

    pred = jax.jit(linear_forward)(data, weight, bias)
    pred = jax.block_until_ready(pred)

    # Sanity check against a plain-JAX reference of the same linear layer.
    ref = data @ weight.T + bias
    assert pred.shape == (N, 1)
    assert jnp.allclose(pred, ref, atol=1e-5, rtol=1e-5)

    # TODO(synk): MyModelClass.loss (ranking / nll / svm) and RankingLoss are
    # training-time loss helpers, not part of forward(); not implemented here.

    print("KERNEL_OK")
</pallas_src>

<mosaic_0001>
module attributes {stable_mosaic.version = 11 : i64} {
  func.func @_linear_kernel(%arg0: i32, %arg1: memref<8x128x32xf32, #tpu.memory_space<vmem>>, %arg2: memref<1x32xf32, #tpu.memory_space<vmem>>, %arg3: memref<1x1xf32, #tpu.memory_space<smem>>, %arg4: memref<8x128xf32, #tpu.memory_space<vmem>>) attributes {dimension_semantics = [#tpu.dimension_semantics<parallel>], iteration_bounds = array<i64: 1>, scalar_prefetch = 0 : i64, scratch_operands = 0 : i64, tpu.core_type = #tpu.core_type<tc>, window_params = [{transform_indices = @transform_0, window_bounds = array<i64: 8, 128, 32>}, {pipeline_mode = #tpu.pipeline_mode<synchronous>, transform_indices = @transform_1, window_bounds = array<i64: 1, 32>}, {transform_indices = @transform_2, window_bounds = array<i64: 1, 1>}, {transform_indices = @transform_3, window_bounds = array<i64: 8, 128>}]} {
    %c0 = arith.constant 0 : index
    %c0_0 = arith.constant 0 : index
    %c0_1 = arith.constant 0 : index
    %0 = vector.load %arg1[%c0, %c0_0, %c0_1] : memref<8x128x32xf32, #tpu.memory_space<vmem>>, vector<8x128x32xf32>
    %c0_2 = arith.constant 0 : index
    %c0_3 = arith.constant 0 : index
    %1 = vector.load %arg2[%c0_2, %c0_3] : memref<1x32xf32, #tpu.memory_space<vmem>>, vector<1x32xf32>
    %2 = vector.shape_cast %1 : vector<1x32xf32> to vector<1x1x32xf32>
    %3 = vector.broadcast %2 : vector<1x1x32xf32> to vector<8x128x32xf32>
    %4 = arith.mulf %0, %3 : vector<8x128x32xf32>
    %cst = arith.constant dense<0.000000e+00> : vector<8x128xf32>
    %5 = vector.multi_reduction <add>, %4, %cst [2] : vector<8x128x32xf32> to vector<8x128xf32>
    %c0_4 = arith.constant 0 : index
    %c0_5 = arith.constant 0 : index
    %6 = memref.load %arg3[%c0_4, %c0_5] : memref<1x1xf32, #tpu.memory_space<smem>>
    %7 = vector.broadcast %6 : f32 to vector<8x128xf32>
    %8 = arith.addf %5, %7 : vector<8x128xf32>
    %c0_6 = arith.constant 0 : index
    %c0_7 = arith.constant 0 : index
    %9 = vector.load %arg4[%c0_6, %c0_7] : memref<8x128xf32, #tpu.memory_space<vmem>>, vector<8x128xf32>
    tpu.vector_store %arg4[%c0_6, %c0_7], %8 {strides = array<i32>} : memref<8x128xf32, #tpu.memory_space<vmem>>, vector<8x128xf32>,
    return
  }
  func.func @transform_0(%arg0: i32) -> (i32, i32, i32) {
    %c0_i32 = arith.constant 0 : i32
    %c0_i32_0 = arith.constant 0 : i32
    %c0_i32_1 = arith.constant 0 : i32
    return %arg0, %c0_i32, %c0_i32_0 : i32, i32, i32
  }
  func.func @transform_1(%arg0: i32) -> (i32, i32) {
    %c0_i32 = arith.constant 0 : i32
    %c0_i32_0 = arith.constant 0 : i32
    %c0_i32_1 = arith.constant 0 : i32
    return %c0_i32, %c0_i32_0 : i32, i32
  }
  func.func @transform_2(%arg0: i32) -> (i32, i32) {
    %c0_i32 = arith.constant 0 : i32
    %c0_i32_0 = arith.constant 0 : i32
    %c0_i32_1 = arith.constant 0 : i32
    return %c0_i32, %c0_i32_0 : i32, i32
  }
  func.func @transform_3(%arg0: i32) -> (i32, i32) {
    %c0_i32 = arith.constant 0 : i32
    %c0_i32_0 = arith.constant 0 : i32
    return %arg0, %c0_i32 : i32, i32
  }
}

</mosaic_0001>

<bundles_post_ra>
// kernel: linear_forward.1
= control target key start
LH: loop header
LB: loop body
LE: loop exit
PB: predicated region body
PF: predicated region fallthrough
CT: control target
= control target key end

     0   :  { %vm278_vm0 = vcmask 261120   ;;  %vm932_vm1 = vcmask 130112   ;;  %vm939_vm2 = vcmask 195712   ;;  %vm946_vm3 = vcmask 261312   ;;  %s2763_s0 = inlined_call_operand.vmem [shape: f32[8,128,32], index: 0, kind: input, shape index: {}]   ;;  %s2764_s1 = inlined_call_operand.vmem [shape: f32[1,32], index: 1, kind: input, shape index: {}]   ;;  %s2765_s2 = inlined_call_operand.<no memory space> [shape: f32[1,1], index: 2, kind: input, shape index: {}]   ;;  %s2766_s3 = inlined_call_operand.vmem [shape: f32[8,128], index: 3, kind: output, shape index: {}]  }
   0x1   :  { %v17_v0 = vld [vmem:[%s2763_s0 + $0x10] sm:$0xff]  ;;  %v1633_v1 = vld [vmem:[%s2764_s1] ss:$0 sm:$0xff]  ;;  %v18_v5 = vld [vmem:[%s2763_s0 + $0x18] sm:$0xff]  ;;  %vm953_vm4 = vcmask 326912   ;;  %vm960_vm5 = vcmask 392512  }
   0x2   :  { %v15_v2 = vld [vmem:[%s2763_s0] sm:$0xff]  ;;  %v152_v3 = vmul.f32 %v1633_v1, %v17_v0  ;;  %v16_v6 = vld [vmem:[%s2763_s0 + $0x8] sm:$0xff]  ;;  %v153_v7 = vmul.f32 %v1633_v1, %v18_v5  ;;  %v22_v17 = vld [vmem:[%s2763_s0 + $0x38] sm:$0xff]  ;;  %vm967_vm6 = vcmask 458112   ;;  %vm974_vm7 = vcmask 523712  }
   0x3   :  { %v150_v4 = vmul.f32 %v1633_v1, %v15_v2  ;;  %v151_v8 = vmul.f32 %v1633_v1, %v16_v6  ;;  %v20_v9 = vld [vmem:[%s2763_s0 + $0x28] sm:$0xff]  ;;  %v19_v10 = vld [vmem:[%s2763_s0 + $0x20] sm:$0xff]  ;;  %v21_v18 = vld [vmem:[%s2763_s0 + $0x30] sm:$0xff]  ;;  %v157_v21 = vmul.f32 %v1633_v1, %v22_v17  ;;  %vm981_vm8 = vcmask 589312  }
   0x4   :  { %v285_v11 = vsel %vm278_vm0, %v152_v3, 0.0  ;;  %v288_v13 = vsel %vm278_vm0, %v153_v7, 0.0  ;;  %v155_v15 = vmul.f32 %v1633_v1, %v20_v9  ;;  %v154_v16 = vmul.f32 %v1633_v1, %v19_v10  ;;  %v24_v23 = vld [vmem:[%s2763_s0 + $0x48] sm:$0xff]  ;;  %v23_v24 = vld [vmem:[%s2763_s0 + $0x40] sm:$0xff]  ;;  %v26_v29 = vld [vmem:[%s2763_s0 + $0x58] sm:$0xff] }
   0x5   :  { %v279_v12 = vsel %vm278_vm0, %v150_v4, 0.0  ;;  %286 = vadd.xlane.f32.xlu1 %v285_v11  ;;  %v282_v14 = vsel %vm278_vm0, %v151_v8, 0.0  ;;  %v156_v22 = vmul.f32 %v1633_v1, %v21_v18  ;;  %v300_v25 = vsel %vm278_vm0, %v157_v21, 0.0  ;;  %v25_v30 = vld [vmem:[%s2763_s0 + $0x50] sm:$0xff]  ;;  %v28_v35 = vld [vmem:[%s2763_s0 + $0x68] sm:$0xff]  ;;  %v27_v36 = vld [vmem:[%s2763_s0 + $0x60] sm:$0xff] }
   0x6   :  { %280 = vadd.xlane.f32.xlu0 %v279_v12  ;;  %v294_v19 = vsel %vm278_vm0, %v155_v15, 0.0  ;;  %v291_v20 = vsel %vm278_vm0, %v154_v16, 0.0  ;;  %v159_v27 = vmul.f32 %v1633_v1, %v24_v23  ;;  %v158_v28 = vmul.f32 %v1633_v1, %v23_v24  ;;  %v30_v41 = vld [vmem:[%s2763_s0 + $0x78] sm:$0xff]  ;;  %v29_v42 = vld [vmem:[%s2763_s0 + $0x70] sm:$0xff]  ;;  %v32_v47 = vld [vmem:[%s2763_s0 + $0x88] sm:$0xff] }
   0x7   :  { %v297_v26 = vsel %vm278_vm0, %v156_v22, 0.0  ;;  %v161_v33 = vmul.f32 %v1633_v1, %v26_v29  ;;  %v160_v34 = vmul.f32 %v1633_v1, %v25_v30  ;;  %v163_v39 = vmul.f32 %v1633_v1, %v28_v35  ;;  %v31_v48 = vld [vmem:[%s2763_s0 + $0x80] sm:$0xff]  ;;  %v34_v53 = vld [vmem:[%s2763_s0 + $0x98] sm:$0xff]  ;;  %v33_v54 = vld [vmem:[%s2763_s0 + $0x90] sm:$0xff] }
   0x8   :  { %v306_v31 = vsel %vm278_vm0, %v159_v27, 0.0  ;;  %v303_v32 = vsel %vm278_vm0, %v158_v28, 0.0  ;;  %v162_v40 = vmul.f32 %v1633_v1, %v27_v36  ;;  %v165_v45 = vmul.f32 %v1633_v1, %v30_v41  ;;  %v36_v59 = vld [vmem:[%s2763_s0 + $0xa8] sm:$0xff]  ;;  %v35_v60 = vld [vmem:[%s2763_s0 + $0xa0] sm:$0xff]  ;;  %v38_v2 = vld [vmem:[%s2763_s0 + $0xb8] sm:$0xff] }
   0x9   :  { %289 = vadd.xlane.f32.xlu1 %v288_v13  ;;  %v312_v37 = vsel %vm278_vm0, %v161_v33, 0.0  ;;  %v309_v38 = vsel %vm278_vm0, %v160_v34, 0.0  ;;  %v318_v43 = vsel %vm278_vm0, %v163_v39, 0.0  ;;  %v164_v46 = vmul.f32 %v1633_v1, %v29_v42  ;;  %v37_v3 = vld [vmem:[%s2763_s0 + $0xb0] sm:$0xff]  ;;  %v40_v8 = vld [vmem:[%s2763_s0 + $0xc8] sm:$0xff]  ;;  %v39_v9 = vld [vmem:[%s2763_s0 + $0xc0] sm:$0xff] }
   0xa   :  { %283 = vadd.xlane.f32.xlu0 %v282_v14  ;;  %v315_v44 = vsel %vm278_vm0, %v162_v40, 0.0  ;;  %v324_v49 = vsel %vm278_vm0, %v165_v45, 0.0  ;;  %v167_v51 = vmul.f32 %v1633_v1, %v32_v47  ;;  %v166_v52 = vmul.f32 %v1633_v1, %v31_v48  ;;  %v42_v14 = vld [vmem:[%s2763_s0 + $0xd8] sm:$0xff]  ;;  %v41_v15 = vld [vmem:[%s2763_s0 + $0xd0] sm:$0xff]  ;;  %v43_v21 = vld [vmem:[%s2763_s0 + $0xe0] sm:$0xff] }
   0xb   :  { %v321_v50 = vsel %vm278_vm0, %v164_v46, 0.0  ;;  %v169_v57 = vmul.f32 %v1633_v1, %v34_v53  ;;  %v168_v58 = vmul.f32 %v1633_v1, %v33_v54  ;;  %v171_v63 = vmul.f32 %v1633_v1, %v36_v59  ;;  %v45_v27 = vld [vmem:[%s2763_s0 + $0xf0] sm:$0xff]  ;;  %v47_v33 = vld [vmem:[%s2763_s0 + $0x100] sm:$0xff] }
   0xc   :  { %v330_v55 = vsel %vm278_vm0, %v167_v51, 0.0  ;;  %v327_v56 = vsel %vm278_vm0, %v166_v52, 0.0  ;;  %v170_v0 = vmul.f32 %v1633_v1, %v35_v60  ;;  %v173_v6 = vmul.f32 %v1633_v1, %v38_v2  ;;  %v49_v39 = vld [vmem:[%s2763_s0 + $0x110] sm:$0xff]  ;;  %v51_v45 = vld [vmem:[%s2763_s0 + $0x120] sm:$0xff] }
   0xd   :  { %295 = vadd.xlane.f32.xlu1 %v294_v19  ;;  %v336_v61 = vsel %vm278_vm0, %v169_v57, 0.0  ;;  %v333_v62 = vsel %vm278_vm0, %v168_v58, 0.0  ;;  %v342_v4 = vsel %vm278_vm0, %v171_v63, 0.0  ;;  %v172_v7 = vmul.f32 %v1633_v1, %v37_v3  ;;  %v53_v51 = vld [vmem:[%s2763_s0 + $0x130] sm:$0xff]  ;;  %v55_v57 = vld [vmem:[%s2763_s0 + $0x140] sm:$0xff] }
   0xe   :  { %292 = vadd.xlane.f32.xlu0 %v291_v20  ;;  %v339_v5 = vsel %vm278_vm0, %v170_v0, 0.0  ;;  %v348_v10 = vsel %vm278_vm0, %v173_v6, 0.0  ;;  %v175_v12 = vmul.f32 %v1633_v1, %v40_v8  ;;  %v174_v13 = vmul.f32 %v1633_v1, %v39_v9  ;;  %v44_v20 = vld [vmem:[%s2763_s0 + $0xe8] sm:$0xff]  ;;  %v57_v63 = vld [vmem:[%s2763_s0 + $0x150] sm:$0xff]  ;;  %v59_v6 = vld [vmem:[%s2763_s0 + $0x160] sm:$0xff] }
   0xf   :  { %v345_v11 = vsel %vm278_vm0, %v172_v7, 0.0  ;;  %v177_v18 = vmul.f32 %v1633_v1, %v42_v14  ;;  %v176_v19 = vmul.f32 %v1633_v1, %v41_v15  ;;  %v179_v24 = vmul.f32 %v1633_v1, %v44_v20 }
  0x10   :  { %v354_v16 = vsel %vm278_vm0, %v175_v12, 0.0  ;;  %v351_v17 = vsel %vm278_vm0, %v174_v13, 0.0  ;;  %v61_v12 = vld [vmem:[%s2763_s0 + $0x170] sm:$0xff]  ;;  %vm988_vm9 = vcmask 654912   ;;  %vm995_vm10 = vcmask 720512  }
  0x11   :  { %301 = vadd.xlane.f32.xlu1 %v300_v25  ;;  %v360_v22 = vsel %vm278_vm0, %v177_v18, 0.0  ;;  %v357_v23 = vsel %vm278_vm0, %v176_v19, 0.0  ;;  %v178_v25 = vmul.f32 %v1633_v1, %v43_v21  ;;  %v366_v28 = vsel %vm278_vm0, %v179_v24, 0.0  ;;  %v63_v18 = vld [vmem:[%s2763_s0 + $0x180] sm:$0xff]  ;;  %v65_v24 = vld [vmem:[%s2763_s0 + $0x190] sm:$0xff] }
  0x12   :  { %298 = vadd.xlane.f32.xlu0 %v297_v26  ;;  %v46_v26 = vld [vmem:[%s2763_s0 + $0xf8] sm:$0xff]  ;;  %vm2767_vm11 = vcmask 786112   ;;  %vm1009_vm12 = vcmask 851712   ;;  %vm1016_vm13 = vcmask 917312   ;;  %vm1023_vm14 = vcmask 982912  }
  0x13   :  { %v363_v29 = vsel %vm278_vm0, %v178_v25, 0.0  ;;  %v181_v30 = vmul.f32 %v1633_v1, %v46_v26  ;;  %vm1030_vm15 = vcmask 1048512  }
  0x15   :  { %307 = vadd.xlane.f32.xlu1 %v306_v31  ;;  %v180_v31 = vmul.f32 %v1633_v1, %v45_v27  ;;  %v372_v34 = vsel %vm278_vm0, %v181_v30, 0.0  ;;  %v67_v30 = vld [vmem:[%s2763_s0 + $0x1a0] sm:$0xff] }
  0x16   :  { %304 = vadd.xlane.f32.xlu0 %v303_v32  ;;  %v48_v32 = vld [vmem:[%s2763_s0 + $0x108] sm:$0xff] }
  0x17   :  { %v369_v35 = vsel %vm278_vm0, %v180_v31, 0.0  ;;  %v183_v36 = vmul.f32 %v1633_v1, %v48_v32 }
  0x19   :  { %313 = vadd.xlane.f32.xlu1 %v312_v37  ;;  %v182_v37 = vmul.f32 %v1633_v1, %v47_v33  ;;  %v378_v40 = vsel %vm278_vm0, %v183_v36, 0.0  ;;  %v69_v36 = vld [vmem:[%s2763_s0 + $0x1b0] sm:$0xff] }
  0x1a   :  { %310 = vadd.xlane.f32.xlu0 %v309_v38  ;;  %v50_v38 = vld [vmem:[%s2763_s0 + $0x118] sm:$0xff] }
  0x1b   :  { %v375_v41 = vsel %vm278_vm0, %v182_v37, 0.0  ;;  %v185_v42 = vmul.f32 %v1633_v1, %v50_v38 }
  0x1d   :  { %319 = vadd.xlane.f32.xlu1 %v318_v43  ;;  %v184_v43 = vmul.f32 %v1633_v1, %v49_v39  ;;  %v384_v46 = vsel %vm278_vm0, %v185_v42, 0.0  ;;  %v71_v42 = vld [vmem:[%s2763_s0 + $0x1c0] sm:$0xff] }
  0x1e   :  { %316 = vadd.xlane.f32.xlu0 %v315_v44  ;;  %v52_v44 = vld [vmem:[%s2763_s0 + $0x128] sm:$0xff] }
  0x1f   :  { %v381_v47 = vsel %vm278_vm0, %v184_v43, 0.0  ;;  %v187_v48 = vmul.f32 %v1633_v1, %v52_v44 }
  0x21   :  { %325 = vadd.xlane.f32.xlu1 %v324_v49  ;;  %v186_v49 = vmul.f32 %v1633_v1, %v51_v45  ;;  %v390_v52 = vsel %vm278_vm0, %v187_v48, 0.0  ;;  %v73_v48 = vld [vmem:[%s2763_s0 + $0x1d0] sm:$0xff] }
  0x22   :  { %322 = vadd.xlane.f32.xlu0 %v321_v50  ;;  %v54_v50 = vld [vmem:[%s2763_s0 + $0x138] sm:$0xff] }
  0x23   :  { %v387_v53 = vsel %vm278_vm0, %v186_v49, 0.0  ;;  %v189_v54 = vmul.f32 %v1633_v1, %v54_v50 }
  0x25   :  { %331 = vadd.xlane.f32.xlu1 %v330_v55  ;;  %v188_v55 = vmul.f32 %v1633_v1, %v53_v51  ;;  %v396_v58 = vsel %vm278_vm0, %v189_v54, 0.0  ;;  %v75_v54 = vld [vmem:[%s2763_s0 + $0x1e0] sm:$0xff] }
  0x26   :  { %328 = vadd.xlane.f32.xlu0 %v327_v56  ;;  %v56_v56 = vld [vmem:[%s2763_s0 + $0x148] sm:$0xff] }
  0x27   :  { %v393_v59 = vsel %vm278_vm0, %v188_v55, 0.0  ;;  %v191_v60 = vmul.f32 %v1633_v1, %v56_v56 }
  0x29   :  { %337 = vadd.xlane.f32.xlu1 %v336_v61  ;;  %v190_v61 = vmul.f32 %v1633_v1, %v55_v57  ;;  %v402_v0 = vsel %vm278_vm0, %v191_v60, 0.0  ;;  %v77_v60 = vld [vmem:[%s2763_s0 + $0x1f0] sm:$0xff] }
  0x2a   :  { %334 = vadd.xlane.f32.xlu0 %v333_v62  ;;  %v58_v62 = vld [vmem:[%s2763_s0 + $0x158] sm:$0xff] }
  0x2b   :  { %v399_v2 = vsel %vm278_vm0, %v190_v61, 0.0  ;;  %v193_v3 = vmul.f32 %v1633_v1, %v58_v62 }
  0x2d   :  { %343 = vadd.xlane.f32.xlu1 %v342_v4  ;;  %v192_v4 = vmul.f32 %v1633_v1, %v57_v63  ;;  %v408_v7 = vsel %vm278_vm0, %v193_v3, 0.0  ;;  %v79_v3 = vld [vmem:[%s2763_s0 + $0x200] sm:$0xff] }
  0x2e   :  { %340 = vadd.xlane.f32.xlu0 %v339_v5  ;;  %v60_v5 = vld [vmem:[%s2763_s0 + $0x168] sm:$0xff] }
  0x2f   :  { %v405_v8 = vsel %vm278_vm0, %v192_v4, 0.0  ;;  %v195_v9 = vmul.f32 %v1633_v1, %v60_v5 }
  0x31   :  { %349 = vadd.xlane.f32.xlu1 %v348_v10  ;;  %v194_v10 = vmul.f32 %v1633_v1, %v59_v6  ;;  %v414_v13 = vsel %vm278_vm0, %v195_v9, 0.0  ;;  %v81_v9 = vld [vmem:[%s2763_s0 + $0x210] sm:$0xff] }
  0x32   :  { %346 = vadd.xlane.f32.xlu0 %v345_v11  ;;  %v62_v11 = vld [vmem:[%s2763_s0 + $0x178] sm:$0xff] }
  0x33   :  { %v411_v14 = vsel %vm278_vm0, %v194_v10, 0.0  ;;  %v197_v15 = vmul.f32 %v1633_v1, %v62_v11 }
  0x35   :  { %355 = vadd.xlane.f32.xlu1 %v354_v16  ;;  %v196_v16 = vmul.f32 %v1633_v1, %v61_v12  ;;  %v420_v19 = vsel %vm278_vm0, %v197_v15, 0.0  ;;  %v83_v15 = vld [vmem:[%s2763_s0 + $0x220] sm:$0xff] }
  0x36   :  { %352 = vadd.xlane.f32.xlu0 %v351_v17  ;;  %v64_v17 = vld [vmem:[%s2763_s0 + $0x188] sm:$0xff] }
  0x37   :  { %v417_v20 = vsel %vm278_vm0, %v196_v16, 0.0  ;;  %v199_v21 = vmul.f32 %v1633_v1, %v64_v17 }
  0x39   :  { %361 = vadd.xlane.f32.xlu1 %v360_v22  ;;  %v198_v22 = vmul.f32 %v1633_v1, %v63_v18  ;;  %v426_v25 = vsel %vm278_vm0, %v199_v21, 0.0  ;;  %v86_v21 = vld [vmem:[%s2763_s0 + $0x238] sm:$0xff] }
  0x3a   :  { %358 = vadd.xlane.f32.xlu0 %v357_v23  ;;  %v66_v23 = vld [vmem:[%s2763_s0 + $0x198] sm:$0xff] }
  0x3b   :  { %v423_v26 = vsel %vm278_vm0, %v198_v22, 0.0  ;;  %v201_v27 = vmul.f32 %v1633_v1, %v66_v23  ;;  %v85_v22 = vld [vmem:[%s2763_s0 + $0x230] sm:$0xff] }
  0x3d   :  { %367 = vadd.xlane.f32.xlu1 %v366_v28  ;;  %v200_v28 = vmul.f32 %v1633_v1, %v65_v24  ;;  %v432_v31 = vsel %vm278_vm0, %v201_v27, 0.0  ;;  %v220_v27 = vmul.f32 %v1633_v1, %v85_v22 }
  0x3e   :  { %364 = vadd.xlane.f32.xlu0 %v363_v29  ;;  %v68_v29 = vld [vmem:[%s2763_s0 + $0x1a8] sm:$0xff] }
  0x3f   :  { %v429_v32 = vsel %vm278_vm0, %v200_v28, 0.0  ;;  %v203_v33 = vmul.f32 %v1633_v1, %v68_v29  ;;  %v88_v28 = vld [vmem:[%s2763_s0 + $0x248] sm:$0xff]  ;;  %v87_v29 = vld [vmem:[%s2763_s0 + $0x240] sm:$0xff] }
  0x41   :  { %373 = vadd.xlane.f32.xlu1 %v372_v34  ;;  %v202_v34 = vmul.f32 %v1633_v1, %v67_v30  ;;  %v438_v37 = vsel %vm278_vm0, %v203_v33, 0.0 }
  0x42   :  { %370 = vadd.xlane.f32.xlu0 %v369_v35  ;;  %v70_v35 = vld [vmem:[%s2763_s0 + $0x1b8] sm:$0xff] }
  0x43   :  { %v435_v38 = vsel %vm278_vm0, %v202_v34, 0.0  ;;  %v205_v39 = vmul.f32 %v1633_v1, %v70_v35  ;;  %v223_v34 = vmul.f32 %v1633_v1, %v88_v28 }
  0x45   :  { %379 = vadd.xlane.f32.xlu1 %v378_v40  ;;  %v204_v40 = vmul.f32 %v1633_v1, %v69_v36  ;;  %v444_v43 = vsel %vm278_vm0, %v205_v39, 0.0  ;;  %v489_v39 = vsel %vm278_vm0, %v220_v27, 0.0 }
  0x46   :  { %376 = vadd.xlane.f32.xlu0 %v375_v41  ;;  %v72_v41 = vld [vmem:[%s2763_s0 + $0x1c8] sm:$0xff] }
  0x47   :  { %v441_v44 = vsel %vm278_vm0, %v204_v40, 0.0  ;;  %v207_v45 = vmul.f32 %v1633_v1, %v72_v41  ;;  %v222_v40 = vmul.f32 %v1633_v1, %v87_v29  ;;  %v90_v41 = vld [vmem:[%s2763_s0 + $0x258] sm:$0xff] }
  0x49   :  { %385 = vadd.xlane.f32.xlu1 %v384_v46  ;;  %v206_v46 = vmul.f32 %v1633_v1, %v71_v42  ;;  %v450_v49 = vsel %vm278_vm0, %v207_v45, 0.0  ;;  %v89_v42 = vld [vmem:[%s2763_s0 + $0x250] sm:$0xff] }
  0x4a   :  { %382 = vadd.xlane.f32.xlu0 %v381_v47  ;;  %v74_v47 = vld [vmem:[%s2763_s0 + $0x1d8] sm:$0xff] }
  0x4b   :  { %v447_v50 = vsel %vm278_vm0, %v206_v46, 0.0  ;;  %v209_v51 = vmul.f32 %v1633_v1, %v74_v47 }
  0x4d   :  { %391 = vadd.xlane.f32.xlu1 %v390_v52  ;;  %v208_v52 = vmul.f32 %v1633_v1, %v73_v48  ;;  %v456_v55 = vsel %vm278_vm0, %v209_v51, 0.0 }
  0x4e   :  { %388 = vadd.xlane.f32.xlu0 %v387_v53  ;;  %v76_v53 = vld [vmem:[%s2763_s0 + $0x1e8] sm:$0xff] }
  0x4f   :  { %v453_v56 = vsel %vm278_vm0, %v208_v52, 0.0  ;;  %v211_v57 = vmul.f32 %v1633_v1, %v76_v53 }
  0x51   :  { %397 = vadd.xlane.f32.xlu1 %v396_v58  ;;  %v210_v58 = vmul.f32 %v1633_v1, %v75_v54  ;;  %v462_v61 = vsel %vm278_vm0, %v211_v57, 0.0 }
  0x52   :  { %394 = vadd.xlane.f32.xlu0 %v393_v59  ;;  %v78_v59 = vld [vmem:[%s2763_s0 + $0x1f8] sm:$0xff] }
  0x53   :  { %v459_v62 = vsel %vm278_vm0, %v210_v58, 0.0  ;;  %v213_v63 = vmul.f32 %v1633_v1, %v78_v59  ;;  %v92_v59 = vld [vmem:[%s2763_s0 + $0x268] sm:$0xff] }
  0x55   :  { %403 = vadd.xlane.f32.xlu1 %v402_v0  ;;  %v212_v0 = vmul.f32 %v1633_v1, %v77_v60  ;;  %v468_v4 = vsel %vm278_vm0, %v213_v63, 0.0  ;;  %v91_v60 = vld [vmem:[%s2763_s0 + $0x260] sm:$0xff] }
  0x56   :  { %400 = vadd.xlane.f32.xlu0 %v399_v2  ;;  %v80_v2 = vld [vmem:[%s2763_s0 + $0x208] sm:$0xff] }
  0x57   :  { %v465_v5 = vsel %vm278_vm0, %v212_v0, 0.0  ;;  %v215_v6 = vmul.f32 %v1633_v1, %v80_v2 }
  0x59   :  { %409 = vadd.xlane.f32.xlu1 %v408_v7  ;;  %v214_v7 = vmul.f32 %v1633_v1, %v79_v3  ;;  %v474_v10 = vsel %vm278_vm0, %v215_v6, 0.0 }
  0x5a   :  { %406 = vadd.xlane.f32.xlu0 %v405_v8  ;;  %v82_v8 = vld [vmem:[%s2763_s0 + $0x218] sm:$0xff] }
  0x5b   :  { %v471_v11 = vsel %vm278_vm0, %v214_v7, 0.0  ;;  %v217_v12 = vmul.f32 %v1633_v1, %v82_v8 }
  0x5d   :  { %415 = vadd.xlane.f32.xlu1 %v414_v13  ;;  %v216_v13 = vmul.f32 %v1633_v1, %v81_v9  ;;  %v480_v17 = vsel %vm278_vm0, %v217_v12, 0.0 }
  0x5e   :  { %412 = vadd.xlane.f32.xlu0 %v411_v14  ;;  %v84_v14 = vld [vmem:[%s2763_s0 + $0x228] sm:$0xff] }
  0x5f   :  { %v219_v16 = vmul.f32 %v1633_v1, %v84_v14  ;;  %v477_v18 = vsel %vm278_vm0, %v216_v13, 0.0 }
  0x61   :  { %421 = vadd.xlane.f32.xlu1 %v420_v19  ;;  %v218_v19 = vmul.f32 %v1633_v1, %v83_v15  ;;  %v486_v23 = vsel %vm278_vm0, %v219_v16, 0.0  ;;  %v94_v15 = vld [vmem:[%s2763_s0 + $0x278] sm:$0xff]  ;;  %v93_v16 = vld [vmem:[%s2763_s0 + $0x270] sm:$0xff] }
  0x62   :  { %418 = vadd.xlane.f32.xlu0 %v417_v20  ;;  %v921_v20 = vlaneseq }
  0x63   :  { %v483_v24 = vsel %vm278_vm0, %v218_v19, 0.0 }
  0x64   :  { %v1998_v30 = vshrl.u32 %v921_v20, 7 }
  0x65   :  { %427 = vadd.xlane.f32.xlu1 %v426_v25  ;;  %v1988_v25 = vand.u32 127, %v921_v20 }
  0x66   :  { %424 = vadd.xlane.f32.xlu0 %v423_v26  ;;  %v221_v26 = vmul.f32 %v1633_v1, %v86_v21 }
  0x67   :  { %v927_v33 = vadd.s32 4294967288, %v1988_v25  ;;  %v934_v35 = vadd.s32 4294967280, %v1988_v25  ;;  %v955_v45 = vadd.s32 4294967256, %v1988_v25  ;;  %v948_v46 = vadd.s32 4294967264, %v1988_v25 }
  0x68   :  { %v969_v63 = vadd.s32 4294967240, %v1988_v25  ;;  %v962_v0 = vadd.s32 4294967248, %v1988_v25  ;;  %v983_v20 = vadd.s32 4294967224, %v1988_v25 }
  0x69   :  { %433 = vadd.xlane.f32.xlu1 %v432_v31  ;;  %v941_v31 = vadd.s32 4294967272, %v1988_v25  ;;  %v2029_v48 = vsub.s32 %v927_v33, %v1998_v30  ;;  %v2034_v51 = vsub.s32 %v934_v35, %v1998_v30  ;;  %v228_v33 = vmul.f32 %v1633_v1, %v93_v16  ;;  %v98_v16 = vld [vmem:[%s2763_s0 + $0x298] sm:$0xff] }
  0x6a   :  { %430 = vadd.xlane.f32.xlu0 %v429_v32  ;;  %v2004_v32 = vstv %s2765_s2  ;;  %v2077_v19 = vsub.s32 %v962_v0, %v1998_v30 }
  0x6d   :  { %439 = vadd.xlane.f32.xlu1 %v438_v37 }
  0x6e   :  { %436 = vadd.xlane.f32.xlu0 %v435_v38  ;;  %v492_v38 = vsel %vm278_vm0, %v221_v26, 0.0 }
  0x71   :  { %445 = vadd.xlane.f32.xlu1 %v444_v43  ;;  %v2020_v43 = vsub.s32 %v1988_v25, %v1998_v30 }
  0x72   :  { %442 = vadd.xlane.f32.xlu0 %v441_v44  ;;  %v2023_v44 = vsub.s32 %v941_v31, %v1998_v30  ;;  %v229_v31 = vmul.f32 %v1633_v1, %v94_v15 }
  0x75   :  { %451 = vadd.xlane.f32.xlu1 %v450_v49  ;;  %v498_v49 = vsel %vm278_vm0, %v223_v34, 0.0 }
  0x76   :  { %448 = vadd.xlane.f32.xlu0 %v447_v50  ;;  %v225_v50 = vmul.f32 %v1633_v1, %v90_v41  ;;  %v997_v41 = vadd.s32 4294967208, %v1988_v25 }
  0x78   :  { %v2123_v0 = vsub.s32 %v997_v41, %v1998_v30 }
  0x79   :  { %457 = vadd.xlane.f32.xlu1 %v456_v55  ;;  %v495_v55 = vsel %vm278_vm0, %v222_v40, 0.0  ;;  %v2099_v40 = vsub.s32 %v983_v20, %v1998_v30 }
  0x7a   :  { %454 = vadd.xlane.f32.xlu0 %v453_v56  ;;  %v224_v56 = vmul.f32 %v1633_v1, %v89_v42 }
  0x7c   :  { %v501_v9 = vsel %vm278_vm0, %v224_v56, 0.0 }
  0x7d   :  { %463 = vadd.xlane.f32.xlu1 %v462_v61  ;;  %v2048_v61 = vsub.s32 %v955_v45, %v1998_v30 }
  0x7e   :  { %460 = vadd.xlane.f32.xlu0 %v459_v62  ;;  %v2051_v62 = vsub.s32 %v948_v46, %v1998_v30 }
  0x81   :  { %469 = vadd.xlane.f32.xlu1 %v468_v4 }
  0x82   :  { %466 = vadd.xlane.f32.xlu0 %v465_v5  ;;  %v504_v5 = vsel %vm278_vm0, %v225_v50, 0.0 }
  0x85   :  { %475 = vadd.xlane.f32.xlu1 %v474_v10  ;;  %v227_v10 = vmul.f32 %v1633_v1, %v92_v59  ;;  %v111_v59 = vld [vmem:[%s2763_s0 + $0x300] sm:$0xff] }
  0x86   :  { %472 = vadd.xlane.f32.xlu0 %v471_v11  ;;  %v226_v11 = vmul.f32 %v1633_v1, %v91_v60  ;;  %v97_v60 = vld [vmem:[%s2763_s0 + $0x290] sm:$0xff] }
  0x87   :  { %v510_v28 = vsel %vm278_vm0, %v227_v10, 0.0 }
  0x88   :  { %v507_v29 = vsel %vm278_vm0, %v226_v11, 0.0  ;;  %v246_v11 = vmul.f32 %v1633_v1, %v111_v59 }
  0x89   :  { %481 = vadd.xlane.f32.xlu1 %v480_v17 }
  0x8a   :  { %478 = vadd.xlane.f32.xlu0 %v477_v18  ;;  %v2074_v18 = vsub.s32 %v969_v63, %v1998_v30 }
  0x8d   :  { %487 = vadd.xlane.f32.xlu1 %v486_v23 }
  0x8e   :  { %484 = vadd.xlane.f32.xlu0 %v483_v24  ;;  %v287_v36 = vpop.xlane.xlu1 %286  ;;  %v976_v24 = vadd.s32 4294967232, %v1988_v25 }
  0x8f   :  { %v281_v37 = vpop.xlane.xlu0 %280  ;;  %v667_v52 = vadd.f32 %v2004_v32, %v287_v36 }
  0x90   :  { %v665_v47 = vadd.f32 %v2004_v32, %v281_v37  ;;  %v96_v37 = vld [vmem:[%s2763_s0 + $0x288] sm:$0xff]  ;;  %v2105_v46 = vsub.s32 %v976_v24, %v1998_v30 }
  0x91   :  { %493 = vadd.xlane.f32.xlu1 %v492_v38  ;;  %v938_v6 = vrot.slane %v667_v52, %v2034_v51  ;;  %v95_v38 = vld [vmem:[%s2763_s0 + $0x280] sm:$0xff]  ;;  %v516_v52 = vsel %vm278_vm0, %v229_v31, 0.0  ;;  %v567_v31 = vsel %vm278_vm0, %v246_v11, 0.0 }
  0x92   :  { %490 = vadd.xlane.f32.xlu0 %v489_v39  ;;  %v290_v53 = vpop.xlane.xlu1 %289  ;;  %v926_v2 = vrot.slane %v665_v47, %v2020_v43  ;;  %v990_v47 = vadd.s32 4294967216, %v1988_v25 }
  0x93   :  { %v284_v54 = vpop.xlane.xlu0 %283  ;;  %v668_v57 = vadd.f32 %v2004_v32, %v290_v53  ;;  %v513_v53 = vsel %vm278_vm0, %v228_v33, 0.0 }
  0x94   :  { %v666_v58 = vadd.f32 %v2004_v32, %v284_v54  ;;  %v231_v54 = vmul.f32 %v1633_v1, %v96_v37 }
  0x95   :  { %v945_v3 = vrot.slane %v668_v57, %v2023_v44  ;;  %499 = vadd.xlane.f32.xlu1 %v498_v49 }
  0x96   :  { %v931_v4 = vrot.slane %v666_v58, %v2029_v48  ;;  %496 = vadd.xlane.f32.xlu0 %v495_v55  ;;  %v296_v7 = vpop.xlane.xlu1 %295  ;;  %v230_v55 = vmul.f32 %v1633_v1, %v95_v38 }
  0x97   :  { %v293_v8 = vpop.xlane.xlu0 %292  ;;  %v670_v13 = vadd.f32 %v2004_v32, %v296_v7 }
  0x98   :  { %v933_v12 = vsel %vm932_vm1, %v931_v4, %v926_v2  ;;  %v669_v14 = vadd.f32 %v2004_v32, %v293_v8  ;;  %v1011_v2 = vadd.s32 4294967192, %v1988_v25  ;;  %v519_v10 = vsel %vm278_vm0, %v230_v55, 0.0 }
  0x99   :  { %v940_v17 = vsel %vm939_vm2, %v938_v6, %v933_v12  ;;  %v959_v21 = vrot.slane %v670_v13, %v2048_v61  ;;  %505 = vadd.xlane.f32.xlu1 %v504_v5  ;;  %v2129_v5 = vsub.s32 %v990_v47, %v1998_v30  ;;  %v1004_v6 = vadd.s32 4294967200, %v1988_v25 }
  0x9a   :  { %v947_v22 = vsel %vm946_vm3, %v945_v3, %v940_v17  ;;  %v952_v23 = vrot.slane %v669_v14, %v2051_v62  ;;  %502 = vadd.xlane.f32.xlu0 %v501_v9  ;;  %v302_v26 = vpop.xlane.xlu1 %301  ;;  %v522_v9 = vsel %vm278_vm0, %v231_v54, 0.0  ;;  %v232_v12 = vmul.f32 %v1633_v1, %v97_v60  ;;  %v112_v17 = vld [vmem:[%s2763_s0 + $0x308] sm:$0xff] }
  0x9b   :  { %v299_v27 = vpop.xlane.xlu0 %298  ;;  %v672_v35 = vadd.f32 %v2004_v32, %v302_v26  ;;  %v2153_v26 = vsub.s32 %v1004_v6, %v1998_v30  ;;  %v128_v60 = vld [vmem:[%s2763_s0 + $0x388] sm:$0xff] }
  0x9c   :  { %v954_v34 = vsel %vm953_vm4, %v952_v23, %v947_v22  ;;  %v671_v36 = vadd.f32 %v2004_v32, %v299_v27  ;;  %v1025_v22 = vadd.s32 4294967176, %v1988_v25  ;;  %v1018_v27 = vadd.s32 4294967184, %v1988_v25  ;;  %v127_v25 = vld [vmem:[%s2763_s0 + $0x380] sm:$0xff] }
  0x9d   :  { %v961_v39 = vsel %vm960_vm5, %v959_v21, %v954_v34  ;;  %v973_v42 = vrot.slane %v672_v35, %v2074_v18  ;;  %511 = vadd.xlane.f32.xlu1 %v510_v28  ;;  %v2147_v21 = vsub.s32 %v1011_v2, %v1998_v30  ;;  %v525_v33 = vsel %vm278_vm0, %v232_v12, 0.0 }
  0x9e   :  { %v966_v45 = vrot.slane %v671_v36, %v2077_v19  ;;  %508 = vadd.xlane.f32.xlu0 %v507_v29  ;;  %v308_v49 = vpop.xlane.xlu1 %307  ;;  %v233_v34 = vmul.f32 %v1633_v1, %v98_v16  ;;  %v247_v35 = vmul.f32 %v1633_v1, %v112_v17  ;;  %v262_v55 = vmul.f32 %v1633_v1, %v127_v25 }
  0x9f   :  { %v305_v50 = vpop.xlane.xlu0 %304  ;;  %v674_v57 = vadd.f32 %v2004_v32, %v308_v49  ;;  %v2176_v49 = vsub.s32 %v1018_v27, %v1998_v30 }
  0xa0   :  { %v968_v56 = vsel %vm967_vm6, %v966_v45, %v961_v39  ;;  %v673_v58 = vadd.f32 %v2004_v32, %v305_v50  ;;  %v113_v39 = vld [vmem:[%s2763_s0 + $0x310] sm:$0xff]  ;;  %v570_v54 = vsel %vm278_vm0, %v247_v35, 0.0  ;;  %v115_v35 = vld [vmem:[%s2763_s0 + $0x320] sm:$0xff] }
  0xa1   :  { %v975_v63 = vsel %vm974_vm7, %v973_v42, %v968_v56  ;;  %v987_v3 = vrot.slane %v674_v57, %v2099_v40  ;;  %517 = vadd.xlane.f32.xlu1 %v516_v52  ;;  %v2171_v42 = vsub.s32 %v1025_v22, %v1998_v30  ;;  %v248_v56 = vmul.f32 %v1633_v1, %v113_v39  ;;  %v99_v30 = vld [vmem:[%s2763_s0 + $0x2a0] sm:$0xff] }
  0xa2   :  { %v980_v4 = vrot.slane %v673_v58, %v2105_v46  ;;  %514 = vadd.xlane.f32.xlu0 %v513_v53  ;;  %v314_v7 = vpop.xlane.xlu1 %313  ;;  %v528_v53 = vsel %vm278_vm0, %v233_v34, 0.0 }
  0xa3   :  { %v311_v8 = vpop.xlane.xlu0 %310  ;;  %v676_v14 = vadd.f32 %v2004_v32, %v314_v7  ;;  %v615_v7 = vsel %vm278_vm0, %v262_v55, 0.0  ;;  %v101_v55 = vld [vmem:[%s2763_s0 + $0x2b0] sm:$0xff] }
  0xa4   :  { %v982_v13 = vsel %vm981_vm8, %v980_v4, %v975_v63  ;;  %v675_v15 = vadd.f32 %v2004_v32, %v311_v8  ;;  %v573_v8 = vsel %vm278_vm0, %v248_v56, 0.0  ;;  %v130_v56 = vld [vmem:[%s2763_s0 + $0x398] sm:$0xff] }
  0xa5   :  { %v989_v20 = vsel %vm988_vm9, %v987_v3, %v982_v13  ;;  %v1001_v23 = vrot.slane %v676_v14, %v2123_v0  ;;  %523 = vadd.xlane.f32.xlu1 %v522_v9  ;;  %v234_v9 = vmul.f32 %v1633_v1, %v99_v30  ;;  %v129_v14 = vld [vmem:[%s2763_s0 + $0x390] sm:$0xff] }
  0xa6   :  { %v994_v24 = vrot.slane %v675_v15, %v2129_v5  ;;  %520 = vadd.xlane.f32.xlu0 %v519_v10  ;;  %v320_v28 = vpop.xlane.xlu1 %319  ;;  %v263_v10 = vmul.f32 %v1633_v1, %v128_v60  ;;  %v114_v15 = vld [vmem:[%s2763_s0 + $0x318] sm:$0xff] }
  0xa7   :  { %v317_v29 = vpop.xlane.xlu0 %316  ;;  %v678_v37 = vadd.f32 %v2004_v32, %v320_v28  ;;  %v264_v28 = vmul.f32 %v1633_v1, %v129_v14 }
  0xa8   :  { %v996_v36 = vsel %vm995_vm10, %v994_v24, %v989_v20  ;;  %v677_v38 = vadd.f32 %v2004_v32, %v317_v29  ;;  %v531_v24 = vsel %vm278_vm0, %v234_v9, 0.0  ;;  %v618_v27 = vsel %vm278_vm0, %v263_v10, 0.0  ;;  %v131_v9 = vld [vmem:[%s2763_s0 + $0x3a0] sm:$0xff]  ;;  %v116_v10 = vld [vmem:[%s2763_s0 + $0x328] sm:$0xff] }
  0xa9   :  { %v1003_v41 = vsel %vm2767_vm11, %v1001_v23, %v996_v36  ;;  %v1015_v45 = vrot.slane %v678_v37, %v2147_v21  ;;  %568 = vadd.xlane.f32.xlu1 %v567_v31  ;;  %v249_v29 = vmul.f32 %v1633_v1, %v114_v15  ;;  %v100_v36 = vld [vmem:[%s2763_s0 + $0x2a8] sm:$0xff] }
  0xaa   :  { %v1008_v47 = vrot.slane %v677_v38, %v2153_v26  ;;  %526 = vadd.xlane.f32.xlu0 %v525_v33  ;;  %v326_v50 = vpop.xlane.xlu1 %325 }
  0xab   :  { %v323_v52 = vpop.xlane.xlu0 %322  ;;  %v680_v58 = vadd.f32 %v2004_v32, %v326_v50  ;;  %v235_v50 = vmul.f32 %v1633_v1, %v100_v36 }
  0xac   :  { %v1010_v57 = vsel %vm1009_vm12, %v1008_v47, %v1003_v41  ;;  %v679_v59 = vadd.f32 %v2004_v32, %v323_v52  ;;  %v621_v41 = vsel %vm278_vm0, %v264_v28, 0.0  ;;  %v250_v47 = vmul.f32 %v1633_v1, %v115_v35 }
  0xad   :  { %v1017_v63 = vsel %vm1016_vm13, %v1015_v45, %v1010_v57  ;;  %v1029_v2 = vrot.slane %v680_v58, %v2171_v42  ;;  %529 = vadd.xlane.f32.xlu1 %v528_v53  ;;  %v576_v45 = vsel %vm278_vm0, %v249_v29, 0.0  ;;  %v117_v29 = vld [vmem:[%s2763_s0 + $0x330] sm:$0xff] }
  0xae   :  { %v1022_v3 = vrot.slane %v679_v59, %v2176_v49  ;;  %571 = vadd.xlane.f32.xlu0 %v570_v54  ;;  %v332_v4 = vpop.xlane.xlu1 %331  ;;  %v579_v60 = vsel %vm278_vm0, %v250_v47, 0.0 }
  0xaf   :  { %v329_v6 = vpop.xlane.xlu0 %328  ;;  %v682_v12 = vadd.f32 %v2004_v32, %v332_v4 }
  0xb0   :  { %v1024_v11 = vsel %vm1023_vm14, %v1022_v3, %v1017_v63  ;;  %v681_v13 = vadd.f32 %v2004_v32, %v329_v6  ;;  %v534_v63 = vsel %vm278_vm0, %v235_v50, 0.0 }
  0xb1   :  { %v2208_v16 = vsel %vm1030_vm15, %v1029_v2, %v1024_v11  ;;  %v1039_v17 = vrot.slane %v682_v12, %v2029_v48  ;;  %616 = vadd.xlane.f32.xlu1 %v615_v7  ;;  %v2248_v2 = vld [vmem:[%s2764_s1] ss:$0 sm:$0xff] }
  0xb2   :  { %v1035_v20 = vrot.slane %v681_v13, %v2020_v43  ;;  %574 = vadd.xlane.f32.xlu0 %v573_v8  ;;  %v338_v22 = vpop.xlane.xlu1 %337  ;;  %v236_v3 = vmul.f32 %v2248_v2, %v101_v55  ;;  %v265_v4 = vmul.f32 %v2248_v2, %v130_v56 }
  0xb3   :  { %v335_v23 = vpop.xlane.xlu0 %334  ;;  %v684_v33 = vadd.f32 %v2004_v32, %v338_v22  ;;  %v266_v22 = vmul.f32 %v2248_v2, %v131_v9 }
  0xb4   :  { %v1040_v31 = vsel %vm932_vm1, %v1039_v17, %v1035_v20  ;;  %v683_v34 = vadd.f32 %v2004_v32, %v335_v23  ;;  %v537_v17 = vsel %vm278_vm0, %v236_v3, 0.0  ;;  %v624_v20 = vsel %vm278_vm0, %v265_v4, 0.0 }
  0xb5   :  { %v1049_v37 = vrot.slane %v684_v33, %v2023_v44  ;;  %532 = vadd.xlane.f32.xlu1 %v531_v24  ;;  %v251_v23 = vmul.f32 %v2248_v2, %v116_v10 }
  0xb6   :  { %v1044_v38 = vrot.slane %v683_v34, %v2034_v51  ;;  %619 = vadd.xlane.f32.xlu0 %v618_v27  ;;  %v344_v25 = vpop.xlane.xlu1 %343 }
  0xb7   :  { %v341_v39 = vpop.xlane.xlu0 %340  ;;  %v686_v53 = vadd.f32 %v2004_v32, %v344_v25  ;;  %v582_v25 = vsel %vm278_vm0, %v251_v23, 0.0 }
  0xb8   :  { %v1045_v52 = vsel %vm939_vm2, %v1044_v38, %v1040_v31  ;;  %v685_v54 = vadd.f32 %v2004_v32, %v341_v39  ;;  %v102_v31 = vld [vmem:[%s2763_s0 + $0x2b8] sm:$0xff]  ;;  %v627_v38 = vsel %vm278_vm0, %v266_v22, 0.0  ;;  %v252_v39 = vmul.f32 %v2248_v2, %v117_v29 }
  0xb9   :  { %v1050_v57 = vsel %vm946_vm3, %v1049_v37, %v1045_v52  ;;  %v1059_v58 = vrot.slane %v686_v53, %v2048_v61  ;;  %622 = vadd.xlane.f32.xlu1 %v621_v41  ;;  %v237_v41 = vmul.f32 %v2248_v2, %v102_v31  ;;  %v103_v52 = vld [vmem:[%s2763_s0 + $0x2c0] sm:$0xff]  ;;  %v132_v53 = vld [vmem:[%s2763_s0 + $0x3a8] sm:$0xff] }
  0xba   :  { %v1054_v1 = vrot.slane %v685_v54, %v2051_v62  ;;  %577 = vadd.xlane.f32.xlu0 %v576_v45  ;;  %v350_v59 = vpop.xlane.xlu1 %349 }
  0xbb   :  { %v347_v30 = vpop.xlane.xlu0 %346  ;;  %v688_v7 = vadd.f32 %v2004_v32, %v350_v59  ;;  %v540_v59 = vsel %vm278_vm0, %v237_v41, 0.0 }
  0xbc   :  { %v1055_v6 = vsel %vm953_vm4, %v1054_v1, %v1050_v57  ;;  %v687_v8 = vadd.f32 %v2004_v32, %v347_v30  ;;  %v585_v1 = vsel %vm278_vm0, %v252_v39, 0.0  ;;  %v238_v30 = vmul.f32 %v2248_v2, %v103_v52 }
  0xbd   :  { %v1060_v11 = vsel %vm960_vm5, %v1059_v58, %v1055_v6  ;;  %v1069_v12 = vrot.slane %v688_v7, %v2074_v18  ;;  %580 = vadd.xlane.f32.xlu1 %v579_v60  ;;  %v267_v60 = vmul.f32 %v2248_v2, %v132_v53  ;;  %v133_v6 = vld [vmem:[%s2763_s0 + $0x3b0] sm:$0xff]  ;;  %v118_v7 = vld [vmem:[%s2763_s0 + $0x338] sm:$0xff] }
  0xbe   :  { %v1064_v13 = vrot.slane %v687_v8, %v2077_v19  ;;  %535 = vadd.xlane.f32.xlu0 %v534_v63  ;;  %v356_v14 = vpop.xlane.xlu1 %355 }
  0xbf   :  { %v353_v15 = vpop.xlane.xlu0 %352  ;;  %v690_v27 = vadd.f32 %v2004_v32, %v356_v14  ;;  %v630_v14 = vsel %vm278_vm0, %v267_v60, 0.0 }
  0xc0   :  { %v1065_v24 = vsel %vm967_vm6, %v1064_v13, %v1060_v11  ;;  %v689_v28 = vadd.f32 %v2004_v32, %v353_v15  ;;  %v543_v13 = vsel %vm278_vm0, %v238_v30, 0.0  ;;  %v268_v15 = vmul.f32 %v2248_v2, %v133_v6 }
  0xc1   :  { %v1070_v33 = vsel %vm974_vm7, %v1069_v12, %v1065_v24  ;;  %v1079_v34 = vrot.slane %v690_v27, %v2099_v40  ;;  %538 = vadd.xlane.f32.xlu1 %v537_v17  ;;  %v253_v17 = vmul.f32 %v2248_v2, %v118_v7  ;;  %v119_v24 = vld [vmem:[%s2763_s0 + $0x340] sm:$0xff]  ;;  %v104_v27 = vld [vmem:[%s2763_s0 + $0x2c8] sm:$0xff] }
  0xc2   :  { %v1074_v35 = vrot.slane %v689_v28, %v2105_v46  ;;  %625 = vadd.xlane.f32.xlu0 %v624_v20  ;;  %v362_v36 = vpop.xlane.xlu1 %361 }
  0xc3   :  { %v359_v37 = vpop.xlane.xlu0 %358  ;;  %v692_v47 = vadd.f32 %v2004_v32, %v362_v36  ;;  %v588_v36 = vsel %vm278_vm0, %v253_v17, 0.0  ;;  %v121_v17 = vld [vmem:[%s2763_s0 + $0x350] sm:$0xff] }
  0xc4   :  { %v1075_v45 = vsel %vm981_vm8, %v1074_v35, %v1070_v33  ;;  %v691_v50 = vadd.f32 %v2004_v32, %v359_v37  ;;  %v633_v35 = vsel %vm278_vm0, %v268_v15, 0.0  ;;  %v254_v37 = vmul.f32 %v2248_v2, %v119_v24 }
  0xc5   :  { %v1080_v54 = vsel %vm988_vm9, %v1079_v34, %v1075_v45  ;;  %v1089_v55 = vrot.slane %v692_v47, %v2123_v0  ;;  %628 = vadd.xlane.f32.xlu1 %v627_v38  ;;  %v239_v38 = vmul.f32 %v2248_v2, %v104_v27  ;;  %v105_v45 = vld [vmem:[%s2763_s0 + $0x2d0] sm:$0xff]  ;;  %v134_v47 = vld [vmem:[%s2763_s0 + $0x3b8] sm:$0xff] }
  0xc6   :  { %v1084_v56 = vrot.slane %v691_v50, %v2129_v5  ;;  %583 = vadd.xlane.f32.xlu0 %v582_v25  ;;  %v368_v57 = vpop.xlane.xlu1 %367 }
  0xc7   :  { %v365_v58 = vpop.xlane.xlu0 %364  ;;  %v694_v3 = vadd.f32 %v2004_v32, %v368_v57  ;;  %v591_v57 = vsel %vm278_vm0, %v254_v37, 0.0 }
  0xc8   :  { %v1085_v63 = vsel %vm995_vm10, %v1084_v56, %v1080_v54  ;;  %v693_v4 = vadd.f32 %v2004_v32, %v365_v58  ;;  %v546_v58 = vsel %vm278_vm0, %v239_v38, 0.0  ;;  %v107_v38 = vld [vmem:[%s2763_s0 + $0x2e0] sm:$0xff] }
  0xc9   :  { %v1090_v8 = vsel %vm2767_vm11, %v1089_v55, %v1085_v63  ;;  %v1099_v9 = vrot.slane %v694_v3, %v2147_v21  ;;  %586 = vadd.xlane.f32.xlu1 %v585_v1  ;;  %vm1585_vm11 = vcmask 1041409   ;;  %v240_v1 = vmul.f32 %v2248_v2, %v105_v45  ;;  %v135_v63 = vld [vmem:[%s2763_s0 + $0x3c0] sm:$0xff]  ;;  %v120_v3 = vld [vmem:[%s2763_s0 + $0x348] sm:$0xff] }
  0xca   :  { %v1094_v10 = vrot.slane %v693_v4, %v2153_v26  ;;  %541 = vadd.xlane.f32.xlu0 %v540_v59  ;;  %v374_v11 = vpop.xlane.xlu1 %373  ;;  %v269_v59 = vmul.f32 %v2248_v2, %v134_v47 }
  0xcb   :  { %v371_v12 = vpop.xlane.xlu0 %370  ;;  %v696_v22 = vadd.f32 %v2004_v32, %v374_v11  ;;  %v270_v11 = vmul.f32 %v2248_v2, %v135_v63 }
  0xcc   :  { %v1095_v20 = vsel %vm1009_vm12, %v1094_v10, %v1090_v8  ;;  %v695_v23 = vadd.f32 %v2004_v32, %v371_v12  ;;  %v636_v10 = vsel %vm278_vm0, %v269_v59, 0.0  ;;  %v255_v12 = vmul.f32 %v2248_v2, %v120_v3  ;;  %v137_v59 = vld [vmem:[%s2763_s0 + $0x3d0] sm:$0xff] }
  0xcd   :  { %v1100_v28 = vsel %vm1016_vm13, %v1099_v9, %v1095_v20  ;;  %v1109_v29 = vrot.slane %v696_v22, %v2171_v42  ;;  %544 = vadd.xlane.f32.xlu1 %v543_v13  ;;  %v549_v9 = vsel %vm278_vm0, %v240_v1, 0.0  ;;  %v106_v20 = vld [vmem:[%s2763_s0 + $0x2d8] sm:$0xff] }
  0xce   :  { %v1104_v31 = vrot.slane %v695_v23, %v2176_v49  ;;  %631 = vadd.xlane.f32.xlu0 %v630_v14  ;;  %v380_v33 = vpop.xlane.xlu1 %379 }
  0xcf   :  { %v377_v34 = vpop.xlane.xlu0 %376  ;;  %v698_v39 = vadd.f32 %v2004_v32, %v380_v33  ;;  %v256_v33 = vmul.f32 %v2248_v2, %v121_v17 }
  0xd0   :  { %v1105_v25 = vsel %vm1023_vm14, %v1104_v31, %v1100_v28  ;;  %v697_v41 = vadd.f32 %v2004_v32, %v377_v34  ;;  %v594_v31 = vsel %vm278_vm0, %v255_v12, 0.0  ;;  %v241_v34 = vmul.f32 %v2248_v2, %v106_v20 }
  0xd1   :  { %v1110_v50 = vsel %vm1030_vm15, %v1109_v29, %v1105_v25  ;;  %v1118_v53 = vrot.slane %v698_v39, %v2029_v48  ;;  %634 = vadd.xlane.f32.xlu1 %v633_v35  ;;  %v639_v29 = vsel %vm278_vm0, %v270_v11, 0.0  ;;  %v136_v25 = vld [vmem:[%s2763_s0 + $0x3c8] sm:$0xff] }
  0xd2   :  { %v2344_v52 = vsel %vm1585_vm11, %v1110_v50, %v2208_v16  ;;  %v1114_v54 = vrot.slane %v697_v41, %v2020_v43  ;;  %589 = vadd.xlane.f32.xlu0 %v588_v36  ;;  %v386_v55 = vpop.xlane.xlu1 %385  ;;  %vm2768_vm11 = vcmask 786112  }
  0xd3   :  { %v383_v56 = vpop.xlane.xlu0 %382  ;;  %v700_v16 = vadd.f32 %v2004_v32, %v386_v55  ;;  %v242_v55 = vmul.f32 %v2248_v2, %v107_v38 }
  0xd4   :  { %v1119_v30 = vsel %vm932_vm1, %v1118_v53, %v1114_v54  ;;  %v699_v60 = vadd.f32 %v2004_v32, %v383_v56  ;;  %v597_v53 = vsel %vm278_vm0, %v256_v33, 0.0  ;;  %v552_v54 = vsel %vm278_vm0, %v241_v34, 0.0 }
  0xd5   :  { %v1128_v4 = vrot.slane %v700_v16, %v2023_v44  ;;  %592 = vadd.xlane.f32.xlu1 %v591_v57  ;;  %v271_v56 = vmul.f32 %v2248_v2, %v136_v25 }
  0xd6   :  { %v1123_v6 = vrot.slane %v699_v60, %v2034_v51  ;;  %547 = vadd.xlane.f32.xlu0 %v546_v58  ;;  %v392_v7 = vpop.xlane.xlu1 %391 }
  0xd7   :  { %v389_v8 = vpop.xlane.xlu0 %388  ;;  %v702_v14 = vadd.f32 %v2004_v32, %v392_v7  ;;  %v642_v7 = vsel %vm278_vm0, %v271_v56, 0.0 }
  0xd8   :  { %v1124_v13 = vsel %vm939_vm2, %v1123_v6, %v1119_v30  ;;  %v701_v15 = vadd.f32 %v2004_v32, %v389_v8  ;;  %v122_v30 = vld [vmem:[%s2763_s0 + $0x358] sm:$0xff]  ;;  %v555_v6 = vsel %vm278_vm0, %v242_v55, 0.0  ;;  %v272_v8 = vmul.f32 %v2248_v2, %v137_v59 }
  0xd9   :  { %v1129_v22 = vsel %vm946_vm3, %v1128_v4, %v1124_v13  ;;  %v1138_v23 = vrot.slane %v702_v14, %v2048_v61  ;;  %550 = vadd.xlane.f32.xlu1 %v549_v9  ;;  %v257_v9 = vmul.f32 %v2248_v2, %v122_v30  ;;  %v123_v13 = vld [vmem:[%s2763_s0 + $0x360] sm:$0xff]  ;;  %v108_v14 = vld [vmem:[%s2763_s0 + $0x2e8] sm:$0xff] }
  0xda   :  { %v1133_v24 = vrot.slane %v701_v15, %v2051_v62  ;;  %637 = vadd.xlane.f32.xlu0 %v636_v10  ;;  %v398_v27 = vpop.xlane.xlu1 %397 }
  0xdb   :  { %v395_v28 = vpop.xlane.xlu0 %394  ;;  %v704_v36 = vadd.f32 %v2004_v32, %v398_v27  ;;  %v600_v27 = vsel %vm278_vm0, %v257_v9, 0.0 }
  0xdc   :  { %v1134_v35 = vsel %vm953_vm4, %v1133_v24, %v1129_v22  ;;  %v703_v37 = vadd.f32 %v2004_v32, %v395_v28  ;;  %v645_v24 = vsel %vm278_vm0, %v272_v8, 0.0  ;;  %v258_v28 = vmul.f32 %v2248_v2, %v123_v13 }
  0xdd   :  { %v1139_v39 = vsel %vm960_vm5, %v1138_v23, %v1134_v35  ;;  %v1148_v41 = vrot.slane %v704_v36, %v2074_v18  ;;  %640 = vadd.xlane.f32.xlu1 %v639_v29  ;;  %v243_v29 = vmul.f32 %v2248_v2, %v108_v14  ;;  %v109_v35 = vld [vmem:[%s2763_s0 + $0x2f0] sm:$0xff]  ;;  %v138_v36 = vld [vmem:[%s2763_s0 + $0x3d8] sm:$0xff] }
  0xde   :  { %v1143_v45 = vrot.slane %v703_v37, %v2077_v19  ;;  %595 = vadd.xlane.f32.xlu0 %v594_v31  ;;  %v404_v47 = vpop.xlane.xlu1 %403 }
  0xdf   :  { %v401_v50 = vpop.xlane.xlu0 %400  ;;  %v706_v58 = vadd.f32 %v2004_v32, %v404_v47  ;;  %v558_v47 = vsel %vm278_vm0, %v243_v29, 0.0 }
  0xe0   :  { %v1144_v57 = vsel %vm967_vm6, %v1143_v45, %v1139_v39  ;;  %v705_v1 = vadd.f32 %v2004_v32, %v401_v50  ;;  %v603_v45 = vsel %vm278_vm0, %v258_v28, 0.0  ;;  %v244_v50 = vmul.f32 %v2248_v2, %v109_v35 }
  0xe1   :  { %v1149_v16 = vsel %vm974_vm7, %v1148_v41, %v1144_v57  ;;  %v1158_v60 = vrot.slane %v706_v58, %v2099_v40  ;;  %598 = vadd.xlane.f32.xlu1 %v597_v53  ;;  %v273_v53 = vmul.f32 %v2248_v2, %v138_v36  ;;  %v139_v57 = vld [vmem:[%s2763_s0 + $0x3e0] sm:$0xff]  ;;  %v124_v58 = vld [vmem:[%s2763_s0 + $0x368] sm:$0xff] }
  0xe2   :  { %v1153_v63 = vrot.slane %v705_v1, %v2105_v46  ;;  %553 = vadd.xlane.f32.xlu0 %v552_v54  ;;  %v410_v3 = vpop.xlane.xlu1 %409 }
  0xe3   :  { %v407_v4 = vpop.xlane.xlu0 %406  ;;  %v708_v11 = vadd.f32 %v2004_v32, %v410_v3  ;;  %v648_v3 = vsel %vm278_vm0, %v273_v53, 0.0  ;;  %v141_v53 = vld [vmem:[%s2763_s0 + $0x3f0] sm:$0xff] }
  0xe4   :  { %v1154_v10 = vsel %vm981_vm8, %v1153_v63, %v1149_v16  ;;  %v707_v12 = vadd.f32 %v2004_v32, %v407_v4  ;;  %v561_v63 = vsel %vm278_vm0, %v244_v50, 0.0  ;;  %v274_v4 = vmul.f32 %v2248_v2, %v139_v57 }
  0xe5   :  { %v1159_v15 = vsel %vm988_vm9, %v1158_v60, %v1154_v10  ;;  %v1168_v17 = vrot.slane %v708_v11, %v2123_v0  ;;  %556 = vadd.xlane.f32.xlu1 %v555_v6  ;;  %v259_v6 = vmul.f32 %v2248_v2, %v124_v58  ;;  %v125_v10 = vld [vmem:[%s2763_s0 + $0x370] sm:$0xff]  ;;  %v110_v11 = vld [vmem:[%s2763_s0 + $0x2f8] sm:$0xff] }
  0xe6   :  { %v1163_v20 = vrot.slane %v707_v12, %v2129_v5  ;;  %643 = vadd.xlane.f32.xlu0 %v642_v7  ;;  %v416_v22 = vpop.xlane.xlu1 %415 }
  0xe7   :  { %v413_v23 = vpop.xlane.xlu0 %412  ;;  %v710_v33 = vadd.f32 %v2004_v32, %v416_v22  ;;  %v651_v22 = vsel %vm278_vm0, %v274_v4, 0.0 }
  0xe8   :  { %v1164_v31 = vsel %vm995_vm10, %v1163_v20, %v1159_v15  ;;  %v709_v34 = vadd.f32 %v2004_v32, %v413_v23  ;;  %v606_v23 = vsel %vm278_vm0, %v259_v6, 0.0 }
  0xe9   :  { %v1169_v37 = vsel %vm2768_vm11, %v1168_v17, %v1164_v31  ;;  %v1178_v38 = vrot.slane %v710_v33, %v2147_v21  ;;  %646 = vadd.xlane.f32.xlu1 %v645_v24  ;;  %vm1587_vm11 = vcmask 1042434   ;;  %v260_v24 = vmul.f32 %v2248_v2, %v125_v10  ;;  %v126_v31 = vld [vmem:[%s2763_s0 + $0x378] sm:$0xff]  ;;  %v140_v33 = vld [vmem:[%s2763_s0 + $0x3e8] sm:$0xff] }
  0xea   :  { %v1173_v25 = vrot.slane %v709_v34, %v2153_v26  ;;  %601 = vadd.xlane.f32.xlu0 %v600_v27  ;;  %v422_v39 = vpop.xlane.xlu1 %421  ;;  %v245_v27 = vmul.f32 %v2248_v2, %v110_v11 }
  0xeb   :  { %v419_v41 = vpop.xlane.xlu0 %418  ;;  %v712_v55 = vadd.f32 %v2004_v32, %v422_v39  ;;  %v261_v39 = vmul.f32 %v2248_v2, %v126_v31 }
  0xec   :  { %v1174_v54 = vsel %vm1009_vm12, %v1173_v25, %v1169_v37  ;;  %v711_v56 = vadd.f32 %v2004_v32, %v419_v41  ;;  %v564_v25 = vsel %vm278_vm0, %v245_v27, 0.0  ;;  %v275_v41 = vmul.f32 %v2248_v2, %v140_v33 }
  0xed   :  { %v1179_v1 = vsel %vm1016_vm13, %v1178_v38, %v1174_v54  ;;  %v1188_v59 = vrot.slane %v712_v55, %v2171_v42  ;;  %604 = vadd.xlane.f32.xlu1 %v603_v45  ;;  %v609_v38 = vsel %vm278_vm0, %v260_v24, 0.0  ;;  %v142_v54 = vld [vmem:[%s2763_s0 + $0x3f8] sm:$0xff] }
  0xee   :  { %v1183_v30 = vrot.slane %v711_v56, %v2176_v49  ;;  %559 = vadd.xlane.f32.xlu0 %v558_v47  ;;  %v428_v16 = vpop.xlane.xlu1 %427 }
  0xef   :  { %v425_v60 = vpop.xlane.xlu0 %424  ;;  %v714_v8 = vadd.f32 %v2004_v32, %v428_v16  ;;  %v276_v16 = vmul.f32 %v2248_v2, %v141_v53 }
  0xf0   :  { %v1184_v7 = vsel %vm1023_vm14, %v1183_v30, %v1179_v1  ;;  %v713_v9 = vadd.f32 %v2004_v32, %v425_v60  ;;  %v654_v30 = vsel %vm278_vm0, %v275_v41, 0.0  ;;  %v277_v60 = vmul.f32 %v2248_v2, %v142_v54 }
  0xf1   :  { %v1189_v12 = vsel %vm1030_vm15, %v1188_v59, %v1184_v7  ;;  %v1197_v14 = vrot.slane %v714_v8, %v2029_v48  ;;  %562 = vadd.xlane.f32.xlu1 %v561_v63  ;;  %v612_v59 = vsel %vm278_vm0, %v261_v39, 0.0  ;;  %v657_v11 = vsel %vm278_vm0, %v276_v16, 0.0 }
  0xf2   :  { %v2475_v13 = vsel %vm1587_vm11, %v1189_v12, %v2344_v52  ;;  %v1193_v15 = vrot.slane %v713_v9, %v2020_v43  ;;  %649 = vadd.xlane.f32.xlu0 %v648_v3  ;;  %v434_v17 = vpop.xlane.xlu1 %433  ;;  %v660_v2 = vsel %vm278_vm0, %v277_v60, 0.0  ;;  %vm2769_vm0 = vcmask 786112  }
  0xf3   :  { %v431_v20 = vpop.xlane.xlu0 %430  ;;  %v716_v52 = vadd.f32 %v2004_v32, %v434_v17  ;;  %vm1589_vm11 = vcmask 1043459  }
  0xf4   :  { %v1198_v28 = vsel %vm932_vm1, %v1197_v14, %v1193_v15  ;;  %v715_v29 = vadd.f32 %v2004_v32, %v431_v20 }
  0xf5   :  { %v1207_v34 = vrot.slane %v716_v52, %v2023_v44  ;;  %652 = vadd.xlane.f32.xlu1 %v651_v22 }
  0xf6   :  { %v1202_v35 = vrot.slane %v715_v29, %v2034_v51  ;;  %607 = vadd.xlane.f32.xlu0 %v606_v23  ;;  %v440_v36 = vpop.xlane.xlu1 %439 }
  0xf7   :  { %v437_v37 = vpop.xlane.xlu0 %436  ;;  %v718_v47 = vadd.f32 %v2004_v32, %v440_v36 }
  0xf8   :  { %v1203_v45 = vsel %vm939_vm2, %v1202_v35, %v1198_v28  ;;  %v717_v50 = vadd.f32 %v2004_v32, %v437_v37 }
  0xf9   :  { %v1208_v55 = vsel %vm946_vm3, %v1207_v34, %v1203_v45  ;;  %v1217_v56 = vrot.slane %v718_v47, %v2048_v61  ;;  %610 = vadd.xlane.f32.xlu1 %v609_v38 }
  0xfa   :  { %v1212_v57 = vrot.slane %v717_v50, %v2051_v62  ;;  %565 = vadd.xlane.f32.xlu0 %v564_v25  ;;  %v446_v58 = vpop.xlane.xlu1 %445 }
  0xfb   :  { %v443_v1 = vpop.xlane.xlu0 %442  ;;  %v720_v3 = vadd.f32 %v2004_v32, %v446_v58 }
  0xfc   :  { %v1213_v63 = vsel %vm953_vm4, %v1212_v57, %v1208_v55  ;;  %v719_v4 = vadd.f32 %v2004_v32, %v443_v1 }
  0xfd   :  { %v1218_v6 = vsel %vm960_vm5, %v1217_v56, %v1213_v63  ;;  %v1227_v7 = vrot.slane %v720_v3, %v2074_v18  ;;  %613 = vadd.xlane.f32.xlu1 %v612_v59 }
  0xfe   :  { %v1222_v8 = vrot.slane %v719_v4, %v2077_v19  ;;  %655 = vadd.xlane.f32.xlu0 %v654_v30  ;;  %v452_v9 = vpop.xlane.xlu1 %451 }
  0xff   :  { %v449_v10 = vpop.xlane.xlu0 %448  ;;  %v722_v14 = vadd.f32 %v2004_v32, %v452_v9 }
 0x100   :  { %v1223_v12 = vsel %vm967_vm6, %v1222_v8, %v1218_v6  ;;  %v721_v15 = vadd.f32 %v2004_v32, %v449_v10 }
 0x101   :  { %v1228_v17 = vsel %vm974_vm7, %v1227_v7, %v1223_v12  ;;  %v1237_v20 = vrot.slane %v722_v14, %v2099_v40  ;;  %661 = vadd.xlane.f32.xlu1 %v660_v2 }
 0x102   :  { %v1232_v22 = vrot.slane %v721_v15, %v2105_v46  ;;  %658 = vadd.xlane.f32.xlu0 %v657_v11  ;;  %v458_v23 = vpop.xlane.xlu1 %457 }
 0x103   :  { %v455_v24 = vpop.xlane.xlu0 %454  ;;  %v724_v28 = vadd.f32 %v2004_v32, %v458_v23 }
 0x104   :  { %v1233_v27 = vsel %vm981_vm8, %v1232_v22, %v1228_v17  ;;  %v723_v52 = vadd.f32 %v2004_v32, %v455_v24 }
 0x105   :  { %v1238_v29 = vsel %vm988_vm9, %v1237_v20, %v1233_v27  ;;  %v1247_v31 = vrot.slane %v724_v28, %v2123_v0 }
 0x106   :  { %v1242_v33 = vrot.slane %v723_v52, %v2129_v5  ;;  %v464_v34 = vpop.xlane.xlu1 %463 }
 0x107   :  { %v461_v35 = vpop.xlane.xlu0 %460  ;;  %v726_v37 = vadd.f32 %v2004_v32, %v464_v34 }
 0x108   :  { %v1243_v36 = vsel %vm995_vm10, %v1242_v33, %v1238_v29  ;;  %v725_v38 = vadd.f32 %v2004_v32, %v461_v35 }
 0x109   :  { %v1248_v25 = vsel %vm2769_vm0, %v1247_v31, %v1243_v36  ;;  %v1257_v39 = vrot.slane %v726_v37, %v2147_v21 }
 0x10a   :  { %v1252_v41 = vrot.slane %v725_v38, %v2153_v26  ;;  %v470_v45 = vpop.xlane.xlu1 %469 }
 0x10b   :  { %v467_v47 = vpop.xlane.xlu0 %466  ;;  %v728_v53 = vadd.f32 %v2004_v32, %v470_v45 }
 0x10c   :  { %v1253_v50 = vsel %vm1009_vm12, %v1252_v41, %v1248_v25  ;;  %v727_v54 = vadd.f32 %v2004_v32, %v467_v47 }
 0x10d   :  { %v1258_v55 = vsel %vm1016_vm13, %v1257_v39, %v1253_v50  ;;  %v1267_v56 = vrot.slane %v728_v53, %v2171_v42 }
 0x10e   :  { %v1262_v57 = vrot.slane %v727_v54, %v2176_v49  ;;  %v476_v58 = vpop.xlane.xlu1 %475 }
 0x10f   :  { %v473_v1 = vpop.xlane.xlu0 %472  ;;  %v730_v30 = vadd.f32 %v2004_v32, %v476_v58 }
 0x110   :  { %v1263_v59 = vsel %vm1023_vm14, %v1262_v57, %v1258_v55  ;;  %v729_v16 = vadd.f32 %v2004_v32, %v473_v1 }
 0x111   :  { %v1268_v60 = vsel %vm1030_vm15, %v1267_v56, %v1263_v59  ;;  %v1276_v3 = vrot.slane %v730_v30, %v2029_v48 }
 0x112   :  { %v2551_v63 = vsel %vm1589_vm11, %v1268_v60, %v2475_v13  ;;  %v1272_v4 = vrot.slane %v729_v16, %v2020_v43  ;;  %v482_v6 = vpop.xlane.xlu1 %481  ;;  %vm1591_vm11 = vcmask 1044484  }
 0x113   :  { %v479_v7 = vpop.xlane.xlu0 %478  ;;  %v732_v9 = vadd.f32 %v2004_v32, %v482_v6 }
 0x114   :  { %v1277_v8 = vsel %vm932_vm1, %v1276_v3, %v1272_v4  ;;  %v731_v10 = vadd.f32 %v2004_v32, %v479_v7 }
 0x115   :  { %v1286_v11 = vrot.slane %v732_v9, %v2023_v44 }
 0x116   :  { %v1281_v2 = vrot.slane %v731_v10, %v2034_v51  ;;  %v488_v12 = vpop.xlane.xlu1 %487 }
 0x117   :  { %v485_v14 = vpop.xlane.xlu0 %484  ;;  %v734_v15 = vadd.f32 %v2004_v32, %v488_v12 }
 0x118   :  { %v1282_v13 = vsel %vm939_vm2, %v1281_v2, %v1277_v8  ;;  %v733_v17 = vadd.f32 %v2004_v32, %v485_v14 }
 0x119   :  { %v1287_v20 = vsel %vm946_vm3, %v1286_v11, %v1282_v13  ;;  %v1296_v22 = vrot.slane %v734_v15, %v2048_v61 }
 0x11a   :  { %v1291_v23 = vrot.slane %v733_v17, %v2051_v62  ;;  %v494_v24 = vpop.xlane.xlu1 %493 }
 0x11b   :  { %v491_v27 = vpop.xlane.xlu0 %490  ;;  %v736_v52 = vadd.f32 %v2004_v32, %v494_v24 }
 0x11c   :  { %v1292_v28 = vsel %vm953_vm4, %v1291_v23, %v1287_v20  ;;  %v735_v29 = vadd.f32 %v2004_v32, %v491_v27 }
 0x11d   :  { %v1297_v31 = vsel %vm960_vm5, %v1296_v22, %v1292_v28  ;;  %v1306_v33 = vrot.slane %v736_v52, %v2074_v18 }
 0x11e   :  { %v1301_v34 = vrot.slane %v735_v29, %v2077_v19  ;;  %v500_v35 = vpop.xlane.xlu1 %499 }
 0x11f   :  { %v497_v36 = vpop.xlane.xlu0 %496  ;;  %v738_v38 = vadd.f32 %v2004_v32, %v500_v35 }
 0x120   :  { %v1302_v37 = vsel %vm967_vm6, %v1301_v34, %v1297_v31  ;;  %v737_v25 = vadd.f32 %v2004_v32, %v497_v36 }
 0x121   :  { %v1307_v39 = vsel %vm974_vm7, %v1306_v33, %v1302_v37  ;;  %v1316_v41 = vrot.slane %v738_v38, %v2099_v40 }
 0x122   :  { %v1311_v45 = vrot.slane %v737_v25, %v2105_v46  ;;  %v506_v47 = vpop.xlane.xlu1 %505 }
 0x123   :  { %v503_v50 = vpop.xlane.xlu0 %502  ;;  %v740_v54 = vadd.f32 %v2004_v32, %v506_v47 }
 0x124   :  { %v1312_v53 = vsel %vm981_vm8, %v1311_v45, %v1307_v39  ;;  %v739_v55 = vadd.f32 %v2004_v32, %v503_v50 }
 0x125   :  { %v1317_v56 = vsel %vm988_vm9, %v1316_v41, %v1312_v53  ;;  %v1326_v57 = vrot.slane %v740_v54, %v2123_v0 }
 0x126   :  { %v1321_v58 = vrot.slane %v739_v55, %v2129_v5  ;;  %v512_v1 = vpop.xlane.xlu1 %511 }
 0x127   :  { %v509_v59 = vpop.xlane.xlu0 %508  ;;  %v742_v16 = vadd.f32 %v2004_v32, %v512_v1 }
 0x128   :  { %v1322_v30 = vsel %vm995_vm10, %v1321_v58, %v1317_v56  ;;  %v741_v60 = vadd.f32 %v2004_v32, %v509_v59 }
 0x129   :  { %v1327_v3 = vsel %vm2769_vm0, %v1326_v57, %v1322_v30  ;;  %v1336_v4 = vrot.slane %v742_v16, %v2147_v21 }
 0x12a   :  { %v1331_v6 = vrot.slane %v741_v60, %v2153_v26  ;;  %v518_v7 = vpop.xlane.xlu1 %517 }
 0x12b   :  { %v515_v8 = vpop.xlane.xlu0 %514  ;;  %v744_v10 = vadd.f32 %v2004_v32, %v518_v7 }
 0x12c   :  { %v1332_v9 = vsel %vm1009_vm12, %v1331_v6, %v1327_v3  ;;  %v743_v11 = vadd.f32 %v2004_v32, %v515_v8 }
 0x12d   :  { %v1337_v2 = vsel %vm1016_vm13, %v1336_v4, %v1332_v9  ;;  %v1346_v12 = vrot.slane %v744_v10, %v2171_v42 }
 0x12e   :  { %v1341_v14 = vrot.slane %v743_v11, %v2176_v49  ;;  %v524_v13 = vpop.xlane.xlu1 %523 }
 0x12f   :  { %v521_v15 = vpop.xlane.xlu0 %520  ;;  %v746_v20 = vadd.f32 %v2004_v32, %v524_v13 }
 0x130   :  { %v1342_v17 = vsel %vm1023_vm14, %v1341_v14, %v1337_v2  ;;  %v745_v22 = vadd.f32 %v2004_v32, %v521_v15 }
 0x131   :  { %v1347_v23 = vsel %vm1030_vm15, %v1346_v12, %v1342_v17  ;;  %v1355_v24 = vrot.slane %v746_v20, %v2029_v48 }
 0x132   :  { %v1351_v27 = vrot.slane %v745_v22, %v2020_v43  ;;  %v2603_v28 = vsel %vm1591_vm11, %v1347_v23, %v2551_v63  ;;  %v569_v52 = vpop.xlane.xlu1 %568 }
 0x133   :  { %v527_v29 = vpop.xlane.xlu0 %526  ;;  %v761_v34 = vadd.f32 %v2004_v32, %v569_v52 }
 0x134   :  { %v1356_v31 = vsel %vm932_vm1, %v1355_v24, %v1351_v27  ;;  %v747_v33 = vadd.f32 %v2004_v32, %v527_v29 }
 0x135   :  { %v1430_v63 = vrot.slane %v761_v34, %v2020_v43 }
 0x136   :  { %v1360_v35 = vrot.slane %v747_v33, %v2034_v51  ;;  %v530_v36 = vpop.xlane.xlu1 %529 }
 0x137   :  { %v572_v37 = vpop.xlane.xlu0 %571  ;;  %v748_v25 = vadd.f32 %v2004_v32, %v530_v36 }
 0x138   :  { %v1361_v38 = vsel %vm939_vm2, %v1360_v35, %v1356_v31  ;;  %v762_v39 = vadd.f32 %v2004_v32, %v572_v37 }
 0x139   :  { %v1365_v41 = vrot.slane %v748_v25, %v2023_v44 }
 0x13a   :  { %v1434_v45 = vrot.slane %v762_v39, %v2029_v48  ;;  %v617_v47 = vpop.xlane.xlu1 %616 }
 0x13b   :  { %v575_v50 = vpop.xlane.xlu0 %574  ;;  %v1366_v53 = vsel %vm946_vm3, %v1365_v41, %v1361_v38  ;;  %v777_v29 = vadd.f32 %v2004_v32, %v617_v47 }
 0x13c   :  { %v1435_v54 = vsel %vm932_vm1, %v1434_v45, %v1430_v63  ;;  %v763_v55 = vadd.f32 %v2004_v32, %v575_v50 }
 0x13d   :  { %v1509_v41 = vrot.slane %v777_v29, %v2020_v43 }
 0x13e   :  { %v1439_v56 = vrot.slane %v763_v55, %v2034_v51  ;;  %v533_v57 = vpop.xlane.xlu1 %532 }
 0x13f   :  { %v620_v58 = vpop.xlane.xlu0 %619  ;;  %v749_v27 = vadd.f32 %v2004_v32, %v533_v57 }
 0x140   :  { %v1440_v1 = vsel %vm939_vm2, %v1439_v56, %v1435_v54  ;;  %v778_v52 = vadd.f32 %v2004_v32, %v620_v58 }
 0x141   :  { %v1370_v36 = vrot.slane %v749_v27, %v2051_v62 }
 0x142   :  { %v623_v59 = vpop.xlane.xlu1 %622  ;;  %v1513_v37 = vrot.slane %v778_v52, %v2029_v48 }
 0x143   :  { %v578_v30 = vpop.xlane.xlu0 %577  ;;  %v779_v31 = vadd.f32 %v2004_v32, %v623_v59  ;;  %v1371_v57 = vsel %vm953_vm4, %v1370_v36, %v1366_v53 }
 0x144   :  { %v764_v33 = vadd.f32 %v2004_v32, %v578_v30  ;;  %v1514_v58 = vsel %vm932_vm1, %v1513_v37, %v1509_v41  ;;  %vm1593_vm1 = vcmask 1045509  }
 0x145   :  { %v1518_v45 = vrot.slane %v779_v31, %v2034_v51 }
 0x146   :  { %v581_v16 = vpop.xlane.xlu1 %580  ;;  %v1444_v54 = vrot.slane %v764_v33, %v2023_v44 }
 0x147   :  { %v536_v60 = vpop.xlane.xlu0 %535  ;;  %v765_v25 = vadd.f32 %v2004_v32, %v581_v16 }
 0x148   :  { %v750_v38 = vadd.f32 %v2004_v32, %v536_v60 }
 0x149   :  { %v1449_v51 = vrot.slane %v765_v25, %v2051_v62 }
 0x14a   :  { %v539_v3 = vpop.xlane.xlu1 %538  ;;  %v1375_v59 = vrot.slane %v750_v38, %v2048_v61 }
 0x14b   :  { %v626_v4 = vpop.xlane.xlu0 %625  ;;  %v751_v39 = vadd.f32 %v2004_v32, %v539_v3  ;;  %v1519_v3 = vsel %vm939_vm2, %v1518_v45, %v1514_v58  ;;  %vm1595_vm2 = vcmask 1046534  }
 0x14c   :  { %v780_v63 = vadd.f32 %v2004_v32, %v626_v4 }
 0x14d   :  { %v1380_v30 = vrot.slane %v751_v39, %v2077_v19 }
 0x14e   :  { %v629_v6 = vpop.xlane.xlu1 %628  ;;  %v1523_v16 = vrot.slane %v780_v63, %v2023_v44 }
 0x14f   :  { %v584_v7 = vpop.xlane.xlu0 %583  ;;  %v781_v47 = vadd.f32 %v2004_v32, %v629_v6 }
 0x150   :  { %v766_v50 = vadd.f32 %v2004_v32, %v584_v7  ;;  %v1445_v7 = vsel %vm946_vm3, %v1444_v54, %v1440_v1  ;;  %v1524_v33 = vsel %vm946_vm3, %v1523_v16, %v1519_v3  ;;  %vm2770_vm3 = vmmov %vm2769_vm0 }
 0x151   :  { %v1528_v4 = vrot.slane %v781_v47, %v2051_v62 }
 0x152   :  { %v587_v8 = vpop.xlane.xlu1 %586  ;;  %v1454_v53 = vrot.slane %v766_v50, %v2048_v61 }
 0x153   :  { %v542_v9 = vpop.xlane.xlu0 %541  ;;  %v767_v48 = vadd.f32 %v2004_v32, %v587_v8 }
 0x154   :  { %v752_v43 = vadd.f32 %v2004_v32, %v542_v9 }
 0x155   :  { %v1459_v8 = vrot.slane %v767_v48, %v2077_v19 }
 0x156   :  { %v545_v10 = vpop.xlane.xlu1 %544  ;;  %v1385_v29 = vrot.slane %v752_v43, %v2074_v18 }
 0x157   :  { %v632_v11 = vpop.xlane.xlu0 %631  ;;  %v753_v60 = vadd.f32 %v2004_v32, %v545_v10  ;;  %v1376_v10 = vsel %vm960_vm5, %v1375_v59, %v1371_v57 }
 0x158   :  { %v782_v6 = vadd.f32 %v2004_v32, %v632_v11  ;;  %v1450_v11 = vsel %vm953_vm4, %v1449_v51, %v1445_v7  ;;  %v1381_v1 = vsel %vm967_vm6, %v1380_v30, %v1376_v10 }
 0x159   :  { %v1455_v36 = vsel %vm960_vm5, %v1454_v53, %v1450_v11  ;;  %v1386_v45 = vsel %vm974_vm7, %v1385_v29, %v1381_v1 }
 0x15a   :  { %v635_v2 = vpop.xlane.xlu1 %634  ;;  %v1533_v37 = vrot.slane %v782_v6, %v2048_v61 }
 0x15b   :  { %v590_v12 = vpop.xlane.xlu0 %589  ;;  %v783_v9 = vadd.f32 %v2004_v32, %v635_v2  ;;  %v1390_v2 = vrot.slane %v753_v60, %v2105_v46 }
 0x15c   :  { %v768_v27 = vadd.f32 %v2004_v32, %v590_v12  ;;  %v1529_v12 = vsel %vm953_vm4, %v1528_v4, %v1524_v33  ;;  %vm2771_vm4 = vmmov %vm2769_vm0 }
 0x15d   :  { %v1534_v48 = vsel %vm960_vm5, %v1533_v37, %v1529_v12  ;;  %vm2772_vm5 = vmmov %vm2769_vm0 }
 0x15e   :  { %v593_v14 = vpop.xlane.xlu1 %592  ;;  %v1464_v25 = vrot.slane %v768_v27, %v2074_v18 }
 0x15f   :  { %v548_v13 = vpop.xlane.xlu0 %547  ;;  %v769_v62 = vadd.f32 %v2004_v32, %v593_v14  ;;  %v1460_v14 = vsel %vm967_vm6, %v1459_v8, %v1455_v36 }
 0x160   :  { %v754_v31 = vadd.f32 %v2004_v32, %v548_v13  ;;  %v1538_v13 = vrot.slane %v783_v9, %v2077_v19  ;;  %v1465_v43 = vsel %vm974_vm7, %v1464_v25, %v1460_v14 }
 0x161   :  { %v1469_v47 = vrot.slane %v769_v62, %v2105_v46 }
 0x162   :  { %v551_v15 = vpop.xlane.xlu1 %550  ;;  %v1395_v50 = vrot.slane %v754_v31, %v2099_v40 }
 0x163   :  { %v2620_v17 = vpop.xlane.xlu0 %637  ;;  %v755_v38 = vadd.f32 %v2004_v32, %v551_v15  ;;  %v1391_v15 = vsel %vm981_vm8, %v1390_v2, %v1386_v45  ;;  %v1470_v30 = vsel %vm981_vm8, %v1469_v47, %v1465_v43 }
 0x164   :  { %v784_v54 = vadd.f32 %v2004_v32, %v2620_v17  ;;  %v1396_v16 = vsel %vm988_vm9, %v1395_v50, %v1391_v15 }
 0x165   :  { %v1400_v57 = vrot.slane %v755_v38, %v2129_v5 }
 0x166   :  { %v2622_v20 = vpop.xlane.xlu1 %640  ;;  %v1543_v3 = vrot.slane %v784_v54, %v2074_v18 }
 0x167   :  { %v596_v22 = vpop.xlane.xlu0 %595  ;;  %v785_v58 = vadd.f32 %v2004_v32, %v2622_v20  ;;  %v1401_v7 = vsel %vm995_vm10, %v1400_v57, %v1396_v16 }
 0x168   :  { %v770_v39 = vadd.f32 %v2004_v32, %v596_v22 }
 0x169   :  { %v1548_v8 = vrot.slane %v785_v58, %v2105_v46 }
 0x16a   :  { %v2624_v23 = vpop.xlane.xlu1 %598  ;;  %v1474_v17 = vrot.slane %v770_v39, %v2099_v40 }
 0x16b   :  { %v554_v24 = vpop.xlane.xlu0 %553  ;;  %v771_v19 = vadd.f32 %v2004_v32, %v2624_v23 }
 0x16c   :  { %v756_v61 = vadd.f32 %v2004_v32, %v554_v24  ;;  %v1539_v24 = vsel %vm967_vm6, %v1538_v13, %v1534_v48  ;;  %vm1597_vm6 = vcmask 1047559  }
 0x16d   :  { %v1479_v4 = vrot.slane %v771_v19, %v2129_v5 }
 0x16e   :  { %v557_v34 = vpop.xlane.xlu1 %556  ;;  %v1405_v60 = vrot.slane %v756_v61, %v2123_v0  ;;  %v1544_v61 = vsel %vm974_vm7, %v1543_v3, %v1539_v24 }
 0x16f   :  { %v2631_v35 = vpop.xlane.xlu0 %643  ;;  %v757_v22 = vadd.f32 %v2004_v32, %v557_v34  ;;  %v1549_v54 = vsel %vm981_vm8, %v1548_v8, %v1544_v61 }
 0x170   :  { %v786_v18 = vadd.f32 %v2004_v32, %v2631_v35  ;;  %v1406_v62 = vsel %vm2770_vm3, %v1405_v60, %v1401_v7 }
 0x171   :  { %v1410_v53 = vrot.slane %v757_v22, %v2153_v26 }
 0x172   :  { %v2645_v55 = vpop.xlane.xlu1 %646  ;;  %v1553_v38 = vrot.slane %v786_v18, %v2099_v40 }
 0x173   :  { %v602_v56 = vpop.xlane.xlu0 %601  ;;  %v1411_v33 = vsel %vm1009_vm12, %v1410_v53, %v1406_v62 }
 0x174   :  { %v772_v20 = vadd.f32 %v2004_v32, %v602_v56  ;;  %v787_v56 = vadd.f32 %v2004_v32, %v2645_v55  ;;  %v1554_v57 = vsel %vm988_vm9, %v1553_v38, %v1549_v54 }
 0x176   :  { %v605_v52 = vpop.xlane.xlu1 %604  ;;  %v1484_v46 = vrot.slane %v772_v20, %v2123_v0  ;;  %v1558_v14 = vrot.slane %v787_v56, %v2129_v5 }
 0x177   :  { %v560_v44 = vpop.xlane.xlu0 %559  ;;  %v773_v6 = vadd.f32 %v2004_v32, %v605_v52 }
 0x178   :  { %v758_v59 = vadd.f32 %v2004_v32, %v560_v44  ;;  %v1475_v44 = vsel %vm988_vm9, %v1474_v17, %v1470_v30 }
 0x179   :  { %v1480_v1 = vsel %vm995_vm10, %v1479_v4, %v1475_v44  ;;  %v1489_v35 = vrot.slane %v773_v6, %v2153_v26 }
 0x17a   :  { %v563_v63 = vpop.xlane.xlu1 %562  ;;  %v1415_v9 = vrot.slane %v758_v59, %v2147_v21 }
 0x17b   :  { %v650_v41 = vpop.xlane.xlu0 %649  ;;  %v759_v23 = vadd.f32 %v2004_v32, %v563_v63 }
 0x17c   :  { %v788_v55 = vadd.f32 %v2004_v32, %v650_v41  ;;  %v1416_v2 = vsel %vm1016_vm13, %v1415_v9, %v1411_v33  ;;  %v1485_v41 = vsel %vm2771_vm4, %v1484_v46, %v1480_v1 }
 0x17d   :  { %v1420_v10 = vrot.slane %v759_v23, %v2176_v49  ;;  %v1490_v40 = vsel %vm1009_vm12, %v1489_v35, %v1485_v41 }
 0x17e   :  { %v653_v51 = vpop.xlane.xlu1 %652  ;;  %v1563_v5 = vrot.slane %v788_v55, %v2123_v0  ;;  %v1559_v0 = vsel %vm995_vm10, %v1558_v14, %v1554_v57 }
 0x17f   :  { %v608_v34 = vpop.xlane.xlu0 %607  ;;  %v789_v12 = vadd.f32 %v2004_v32, %v653_v51  ;;  %v1421_v13 = vsel %vm1023_vm14, %v1420_v10, %v1416_v2 }
 0x180   :  { %v774_v27 = vadd.f32 %v2004_v32, %v608_v34  ;;  %v1564_v23 = vsel %vm2772_vm5, %v1563_v5, %v1559_v0 }
 0x181   :  { %v1568_v19 = vrot.slane %v789_v12, %v2153_v26 }
 0x182   :  { %v611_v52 = vpop.xlane.xlu1 %610  ;;  %v1494_v36 = vrot.slane %v774_v27, %v2147_v21 }
 0x183   :  { %v566_v29 = vpop.xlane.xlu0 %565  ;;  %v775_v31 = vadd.f32 %v2004_v32, %v611_v52  ;;  %v1569_v34 = vsel %vm1009_vm12, %v1568_v19, %v1564_v23 }
 0x184   :  { %v760_v11 = vadd.f32 %v2004_v32, %v566_v29  ;;  %v1495_v22 = vsel %vm1016_vm13, %v1494_v36, %v1490_v40 }
 0x185   :  { %v1499_v25 = vrot.slane %v775_v31, %v2176_v49 }
 0x186   :  { %v1425_v37 = vrot.slane %v760_v11, %v2171_v42  ;;  %v614_v39 = vpop.xlane.xlu1 %613 }
 0x187   :  { %v656_v63 = vpop.xlane.xlu0 %655  ;;  %v776_v47 = vadd.f32 %v2004_v32, %v614_v39  ;;  %v1500_v58 = vsel %vm1023_vm14, %v1499_v25, %v1495_v22 }
 0x188   :  { %v1426_v45 = vsel %vm1030_vm15, %v1425_v37, %v1421_v13  ;;  %v790_v50 = vadd.f32 %v2004_v32, %v656_v63 }
 0x189   :  { %v1594_v15 = vsel %vm1593_vm1, %v1426_v45, %v2603_v28  ;;  %v1504_v48 = vrot.slane %v776_v47, %v2171_v42 }
 0x18a   :  { %v1573_v59 = vrot.slane %v790_v50, %v2147_v21  ;;  %v662_v43 = vpop.xlane.xlu1 %661 }
 0x18b   :  { %v659_v24 = vpop.xlane.xlu0 %658  ;;  %v1505_v28 = vsel %vm1030_vm15, %v1504_v48, %v1500_v58  ;;  %v792_v26 = vadd.f32 %v2004_v32, %v662_v43 }
 0x18c   :  { %v791_v17 = vadd.f32 %v2004_v32, %v659_v24  ;;  %v1596_v51 = vsel %vm1595_vm2, %v1505_v28, %v1594_v15  ;;  %v1574_v16 = vsel %vm1016_vm13, %v1573_v59, %v1569_v34 }
 0x18d   :  { %v1583_v21 = vrot.slane %v792_v26, %v2171_v42 }
 0x18e   :  { %v1578_v30 = vrot.slane %v791_v17, %v2176_v49 }
 0x190   :  { %v1579_v60 = vsel %vm1023_vm14, %v1578_v30, %v1574_v16 }
 0x191   :  { %v1584_v20 = vsel %vm1030_vm15, %v1583_v21, %v1579_v60 }
 0x192   :  { %v1598_v3 = vsel %vm1597_vm6, %v1584_v20, %v1596_v51 }
 0x193   :  { %1600 = vst [vmem:[%s2766_s3] sm:$0xff] %v1598_v3 }

</bundles_post_ra>
